<compile_context>
chip_gen: v6e
topology: v6e:2x2x1
jax: 0.10.0
libtpu: 0.0.40
codegen_flags: <defaults>
</compile_context>

<pallas_src>
import jax
import jax.numpy as jnp
from jax import lax
from jax.experimental import pallas as pl
from jax.experimental.pallas import tpu as pltpu


# ----------------------------- Pallas kernel -------------------------------


def _bigru_maxpool_label_kernel(
    xp_ref,     # (T, Bb, 2E)  time-major paired encodes: xp[t] = [x[t] | x[T-1-t]]
    win_ref,    # (2E, 6H)     fused input weights, interleaved gate cols
    bin_ref,    # (1, 6H)      folded input bias (bi + bh for r,z; bi only for n)
    wh_ref,     # (2H, 6H)     block-diagonal hidden weights (interleaved gate cols)
    bhn_ref,    # (1, 2H)      [bh_n_fwd | bh_n_bwd]
    wlab_ref,   # (2H, L)      hidden2label weight (rows: [fwd half; bwd half])
    blab_ref,   # (1, L)       hidden2label bias
    out_ref,    # (Bb, L)      logits
):
    T, B, E2 = xp_ref.shape
    H6 = win_ref.shape[1]
    H2 = wh_ref.shape[0]

    # ---- hoisted input projection (both directions, one matmul, bias folded) ----
    xp = xp_ref[...].reshape(T * B, E2)
    gi = (jnp.dot(xp, win_ref[...], preferred_element_type=jnp.float32)
          + bin_ref[...]).reshape(T, B, H6)

    wh = wh_ref[...]                                   # held across the loop
    bh_n = jnp.broadcast_to(bhn_ref[...], (B, H2))     # hoisted broadcast

    # packed state: columns [0:H] forward hidden, [H:2H] backward hidden
    h = jnp.zeros((B, H2), jnp.float32)
    m = None

    # PyTorch nn.GRU cell, gate order (r, z, n):
    #   r = sigmoid(x W_ir + b_ir + h W_hr + b_hr)
    #   z = sigmoid(x W_iz + b_iz + h W_hz + b_hz)
    #   n = tanh  (x W_in + b_in + r * (h W_hn + b_hn))
    #   h' = (1 - z) * n + z * h
    # Fully unrolled: T is static & small; all slices are static and lane-aligned.
    for t in range(T):
        gi_t = gi[t]                                                    # (B, 6H)
        gh = jnp.dot(h, wh, preferred_element_type=jnp.float32)         # one MXU op
        r = jax.nn.sigmoid(gi_t[:, 0:H2] + gh[:, 0:H2])
        z = jax.nn.sigmoid(gi_t[:, H2:2 * H2] + gh[:, H2:2 * H2])
        n = jnp.tanh(gi_t[:, 2 * H2:] + r * (gh[:, 2 * H2:] + bh_n))
        h = (1.0 - z) * n + z * h
        # max over time (F.max_pool1d over the full padded length) is
        # order-independent -> running elementwise max per direction.
        m = h if m is None else jnp.maximum(m, h)

    # hidden2label on concat([max_fwd, max_bwd]) == packed (B, 2H) @ (2H, L).
    out_ref[...] = (jnp.dot(m, wlab_ref[...], preferred_element_type=jnp.float32)
                    + blab_ref[...])


# ------------------------- weight packing helpers ---------------------------


def _interleave_gates(mat_f, mat_b, H):
    """(rows, 3H) x2 with gate order (r,z,n) -> (rows, 6H) with column order
    [r_f, r_b, z_f, z_b, n_f, n_b]."""
    cols = []
    for g in range(3):
        cols.append(mat_f[:, g * H:(g + 1) * H])
        cols.append(mat_b[:, g * H:(g + 1) * H])
    return jnp.concatenate(cols, axis=-1)


# ------------------------------ JAX wrapper ---------------------------------


@jax.jit
def gru_head_forward(encodes, params):
    """encodes: (B, T, E) float32; returns logits (B, L)."""
    B, T, E = encodes.shape
    H = params["wh_f"].shape[0]
    L = params["w_lab"].shape[1]
    H2, H6, E2 = 2 * H, 6 * H, 2 * E

    # Pair each step's forward input with the mirrored backward input along the
    # feature axis; the kernel then needs a single fused input projection.
    xp = jnp.concatenate([encodes, encodes[:, ::-1, :]], axis=-1)   # (B, T, 2E)
    xp = jnp.transpose(xp, (1, 0, 2))                               # (T, B, 2E)

    # --- pack weights into the fused / interleaved kernel layout (tiny, one-off) ---
    zw_i = jnp.zeros_like(params["wi_f"])
    zw_h = jnp.zeros_like(params["wh_f"])
    w_in = jnp.concatenate(
        [_interleave_gates(params["wi_f"], zw_i, H),
         _interleave_gates(zw_i, params["wi_b"], H)], axis=0)       # (2E, 6H)
    w_hh = jnp.concatenate(
        [_interleave_gates(params["wh_f"], zw_h, H),
         _interleave_gates(zw_h, params["wh_b"], H)], axis=0)       # (2H, 6H) block-diag

    bhf, bhb = params["bh_f"], params["bh_b"]
    # fold bh into the hoisted input bias for r and z gates; keep bh_n separate
    # (it sits inside r * (...)).
    bi_fold_f = params["bi_f"] + jnp.concatenate(
        [bhf[:, :2 * H], jnp.zeros_like(bhf[:, 2 * H:])], axis=1)
    bi_fold_b = params["bi_b"] + jnp.concatenate(
        [bhb[:, :2 * H], jnp.zeros_like(bhb[:, 2 * H:])], axis=1)
    b_in = _interleave_gates(bi_fold_f, bi_fold_b, H)               # (1, 6H)
    bh_n = jnp.concatenate([bhf[:, 2 * H:], bhb[:, 2 * H:]], axis=1)  # (1, 2H)

    in_arrays = (xp, w_in, b_in, w_hh, bh_n, params["w_lab"], params["b_lab"])

    # Batch-parallel grid (one block at toy sizes; shards batch across the two
    # TensorCores on v7x once B spans multiple blocks).
    BB = B                        # batch block size (whole batch here)
    grid = (B // BB,)

    in_specs = [
        pl.BlockSpec((T, BB, E2), lambda b: (0, b, 0)),
        pl.BlockSpec((E2, H6), lambda b: (0, 0)),
        pl.BlockSpec((1, H6), lambda b: (0, 0)),
        pl.BlockSpec((H2, H6), lambda b: (0, 0)),
        pl.BlockSpec((1, H2), lambda b: (0, 0)),
        pl.BlockSpec((H2, L), lambda b: (0, 0)),
        pl.BlockSpec((1, L), lambda b: (0, 0)),
    ]
    out_specs = pl.BlockSpec((BB, L), lambda b: (b, 0))

    return pl.pallas_call(
        _bigru_maxpool_label_kernel,
        out_shape=jax.ShapeDtypeStruct((B, L), jnp.float32),
        grid=grid,
        in_specs=in_specs,
        out_specs=out_specs,
        compiler_params=pltpu.CompilerParams(
            dimension_semantics=("parallel",)),
    )(*in_arrays)


# --------------------------- parameter creation ------------------------------


def init_params(key, encode_dim, hidden_dim, label_size):
    """Deterministic init mimicking nn.GRU / nn.Linear (uniform +-1/sqrt(H)).

    Gate-fused layout: weights are (in_dim, 3H) with PyTorch gate order (r,z,n)
    along the last axis (i.e. weight_ih_l0.T / weight_hh_l0.T)."""
    E, H, L = encode_dim, hidden_dim, label_size
    ks = jax.random.split(key, 10)
    s = float(H) ** -0.5
    sl = float(2 * H) ** -0.5

    def u(k, shape, scale):
        return jax.random.uniform(k, shape, jnp.float32, -scale, scale)

    return {
        "wi_f": u(ks[0], (E, 3 * H), s),
        "wh_f": u(ks[1], (H, 3 * H), s),
        "bi_f": u(ks[2], (1, 3 * H), s),
        "bh_f": u(ks[3], (1, 3 * H), s),
        "wi_b": u(ks[4], (E, 3 * H), s),
        "wh_b": u(ks[5], (H, 3 * H), s),
        "bi_b": u(ks[6], (1, 3 * H), s),
        "bh_b": u(ks[7], (1, 3 * H), s),
        "w_lab": u(ks[8], (2 * H, L), sl),   # rows: [fwd half; bwd half]
        "b_lab": u(ks[9], (1, L), sl),
    }


# ------------------------- pure-JAX reference check --------------------------


def reference_forward(encodes, params):
    B, T, E = encodes.shape
    H = params["wh_f"].shape[0]

    def cell(x_t, h, wi, wh, bi, bh):
        gi = x_t @ wi + bi
        gh = h @ wh + bh
        r = jax.nn.sigmoid(gi[:, :H] + gh[:, :H])
        z = jax.nn.sigmoid(gi[:, H:2 * H] + gh[:, H:2 * H])
        n = jnp.tanh(gi[:, 2 * H:] + r * gh[:, 2 * H:])
        return (1.0 - z) * n + z * h

    def scan_dir(xs, wi, wh, bi, bh):
        def step(h, x_t):
            h = cell(x_t, h, wi, wh, bi, bh)
            return h, h
        _, hs = lax.scan(step, jnp.zeros((B, H), jnp.float32), xs)
        return hs  # (T, B, H)

    x_tm = jnp.transpose(encodes, (1, 0, 2))
    hs_f = scan_dir(x_tm, params["wi_f"], params["wh_f"], params["bi_f"], params["bh_f"])
    hs_b = scan_dir(x_tm[::-1], params["wi_b"], params["wh_b"], params["bi_b"], params["bh_b"])
    m = jnp.concatenate([hs_f.max(0), hs_b.max(0)], axis=-1)  # (B, 2H)
    return m @ params["w_lab"] + params["b_lab"]


# ----------------------------------- main ------------------------------------


if __name__ == "__main__":
    B, T = 8, 8            # batch_size, max_len
    ENCODE_DIM = 64        # encode_dim (GRU input size); 2E = 128 -> lane-aligned
    HIDDEN_DIM = 64        # hidden_dim per direction;     2H = 128 -> lane-aligned
    LABEL_SIZE = 4

    key = jax.random.PRNGKey(0)
    k_x, k_p = jax.random.split(key)

    # `encodes` stands in for the padded BatchTreeEncoder output (B, max_len, encode_dim).
    encodes = jax.random.normal(k_x, (B, T, ENCODE_DIM), jnp.float32)
    params = init_params(k_p, ENCODE_DIM, HIDDEN_DIM, LABEL_SIZE)

    y = gru_head_forward(encodes, params)
    y = jax.block_until_ready(y)

    y_ref = reference_forward(encodes, params)
    assert y.shape == (B, LABEL_SIZE)
    assert jnp.allclose(y, y_ref, atol=1e-4, rtol=1e-3), "mismatch vs reference"

    print("KERNEL_OK")
</pallas_src>

<mosaic_0001>
module attributes {stable_mosaic.version = 11 : i64} {
  func.func @_bigru_maxpool_label_kernel(%arg0: i32, %arg1: memref<8x8x128xf32, #tpu.memory_space<vmem>>, %arg2: memref<128x384xf32, #tpu.memory_space<vmem>>, %arg3: memref<1x384xf32, #tpu.memory_space<vmem>>, %arg4: memref<128x384xf32, #tpu.memory_space<vmem>>, %arg5: memref<1x128xf32, #tpu.memory_space<vmem>>, %arg6: memref<128x4xf32, #tpu.memory_space<vmem>>, %arg7: memref<1x4xf32, #tpu.memory_space<vmem>>, %arg8: memref<8x4xf32, #tpu.memory_space<vmem>>) attributes {dimension_semantics = [#tpu.dimension_semantics<parallel>], iteration_bounds = array<i64: 1>, scalar_prefetch = 0 : i64, scratch_operands = 0 : i64, tpu.core_type = #tpu.core_type<tc>, window_params = [{transform_indices = @transform_0, window_bounds = array<i64: 8, 8, 128>}, {pipeline_mode = #tpu.pipeline_mode<synchronous>, transform_indices = @transform_1, window_bounds = array<i64: 128, 384>}, {pipeline_mode = #tpu.pipeline_mode<synchronous>, transform_indices = @transform_2, window_bounds = array<i64: 1, 384>}, {pipeline_mode = #tpu.pipeline_mode<synchronous>, transform_indices = @transform_3, window_bounds = array<i64: 128, 384>}, {pipeline_mode = #tpu.pipeline_mode<synchronous>, transform_indices = @transform_4, window_bounds = array<i64: 1, 128>}, {pipeline_mode = #tpu.pipeline_mode<synchronous>, transform_indices = @transform_5, window_bounds = array<i64: 128, 4>}, {pipeline_mode = #tpu.pipeline_mode<synchronous>, transform_indices = @transform_6, window_bounds = array<i64: 1, 4>}, {transform_indices = @transform_7, window_bounds = array<i64: 8, 4>}]} {
    %c0 = arith.constant 0 : index
    %c0_0 = arith.constant 0 : index
    %c0_1 = arith.constant 0 : index
    %0 = vector.load %arg1[%c0, %c0_0, %c0_1] : memref<8x8x128xf32, #tpu.memory_space<vmem>>, vector<8x8x128xf32>
    %1 = vector.shape_cast %0 : vector<8x8x128xf32> to vector<64x128xf32>
    %c0_2 = arith.constant 0 : index
    %c0_3 = arith.constant 0 : index
    %2 = vector.load %arg2[%c0_2, %c0_3] : memref<128x384xf32, #tpu.memory_space<vmem>>, vector<128x384xf32>
    %cst = arith.constant dense<0.000000e+00> : vector<64x384xf32>
    %3 = tpu.matmul %1, %2, %cst {dimension_numbers = #tpu.dot_dimension_numbers<[1], [0], [0], [1], [0, 0, 1, 1], [], []>} : vector<64x128xf32>, vector<128x384xf32>, vector<64x384xf32> -> vector<64x384xf32>
    %c0_4 = arith.constant 0 : index
    %c0_5 = arith.constant 0 : index
    %4 = vector.load %arg3[%c0_4, %c0_5] : memref<1x384xf32, #tpu.memory_space<vmem>>, vector<1x384xf32>
    %5 = vector.broadcast %4 : vector<1x384xf32> to vector<64x384xf32>
    %6 = arith.addf %3, %5 : vector<64x384xf32>
    %7 = vector.shape_cast %6 : vector<64x384xf32> to vector<8x8x384xf32>
    %c0_6 = arith.constant 0 : index
    %c0_7 = arith.constant 0 : index
    %8 = vector.load %arg4[%c0_6, %c0_7] : memref<128x384xf32, #tpu.memory_space<vmem>>, vector<128x384xf32>
    %c0_8 = arith.constant 0 : index
    %c0_9 = arith.constant 0 : index
    %9 = vector.load %arg5[%c0_8, %c0_9] : memref<1x128xf32, #tpu.memory_space<vmem>>, vector<1x128xf32>
    %10 = vector.shape_cast %9 : vector<1x128xf32> to vector<1x128xf32>
    %11 = vector.broadcast %10 : vector<1x128xf32> to vector<8x128xf32>
    %cst_10 = arith.constant 0.000000e+00 : f32
    %12 = vector.broadcast %cst_10 : f32 to vector<8x128xf32>
    %13 = vector.extract_strided_slice %7 {offsets = [0, 0, 0], sizes = [1, 8, 384], strides = [1, 1, 1]} : vector<8x8x384xf32> to vector<1x8x384xf32>
    %14 = vector.shape_cast %13 : vector<1x8x384xf32> to vector<8x384xf32>
    %cst_11 = arith.constant dense<0.000000e+00> : vector<8x384xf32>
    %15 = tpu.matmul %12, %8, %cst_11 {dimension_numbers = #tpu.dot_dimension_numbers<[1], [0], [0], [1], [0, 0, 1, 1], [], []>} : vector<8x128xf32>, vector<128x384xf32>, vector<8x384xf32> -> vector<8x384xf32>
    %16 = vector.extract_strided_slice %14 {offsets = [0, 0], sizes = [8, 128], strides = [1, 1]} : vector<8x384xf32> to vector<8x128xf32>
    %17 = vector.extract_strided_slice %15 {offsets = [0, 0], sizes = [8, 128], strides = [1, 1]} : vector<8x384xf32> to vector<8x128xf32>
    %18 = arith.addf %16, %17 : vector<8x128xf32>
    %19 = arith.negf %18 : vector<8x128xf32>
    %20 = math.exp %19 : vector<8x128xf32>
    %cst_12 = arith.constant 1.000000e+00 : f32
    %21 = vector.broadcast %cst_12 : f32 to vector<8x128xf32>
    %22 = arith.addf %21, %20 : vector<8x128xf32>
    %23 = arith.divf %21, %22 : vector<8x128xf32>
    %24 = vector.extract_strided_slice %14 {offsets = [0, 128], sizes = [8, 128], strides = [1, 1]} : vector<8x384xf32> to vector<8x128xf32>
    %25 = vector.extract_strided_slice %15 {offsets = [0, 128], sizes = [8, 128], strides = [1, 1]} : vector<8x384xf32> to vector<8x128xf32>
    %26 = arith.addf %24, %25 : vector<8x128xf32>
    %27 = arith.negf %26 : vector<8x128xf32>
    %28 = math.exp %27 : vector<8x128xf32>
    %cst_13 = arith.constant 1.000000e+00 : f32
    %29 = vector.broadcast %cst_13 : f32 to vector<8x128xf32>
    %30 = arith.addf %29, %28 : vector<8x128xf32>
    %31 = arith.divf %29, %30 : vector<8x128xf32>
    %32 = vector.extract_strided_slice %14 {offsets = [0, 256], sizes = [8, 128], strides = [1, 1]} : vector<8x384xf32> to vector<8x128xf32>
    %33 = vector.extract_strided_slice %15 {offsets = [0, 256], sizes = [8, 128], strides = [1, 1]} : vector<8x384xf32> to vector<8x128xf32>
    %34 = arith.addf %33, %11 : vector<8x128xf32>
    %35 = arith.mulf %23, %34 : vector<8x128xf32>
    %36 = arith.addf %32, %35 : vector<8x128xf32>
    %37 = math.tanh %36 : vector<8x128xf32>
    %cst_14 = arith.constant 1.000000e+00 : f32
    %38 = vector.broadcast %cst_14 : f32 to vector<8x128xf32>
    %39 = arith.subf %38, %31 : vector<8x128xf32>
    %40 = arith.mulf %39, %37 : vector<8x128xf32>
    %41 = arith.mulf %31, %12 : vector<8x128xf32>
    %42 = arith.addf %40, %41 : vector<8x128xf32>
    %43 = vector.extract_strided_slice %7 {offsets = [1, 0, 0], sizes = [1, 8, 384], strides = [1, 1, 1]} : vector<8x8x384xf32> to vector<1x8x384xf32>
    %44 = vector.shape_cast %43 : vector<1x8x384xf32> to vector<8x384xf32>
    %cst_15 = arith.constant dense<0.000000e+00> : vector<8x384xf32>
    %45 = tpu.matmul %42, %8, %cst_15 {dimension_numbers = #tpu.dot_dimension_numbers<[1], [0], [0], [1], [0, 0, 1, 1], [], []>} : vector<8x128xf32>, vector<128x384xf32>, vector<8x384xf32> -> vector<8x384xf32>
    %46 = vector.extract_strided_slice %44 {offsets = [0, 0], sizes = [8, 128], strides = [1, 1]} : vector<8x384xf32> to vector<8x128xf32>
    %47 = vector.extract_strided_slice %45 {offsets = [0, 0], sizes = [8, 128], strides = [1, 1]} : vector<8x384xf32> to vector<8x128xf32>
    %48 = arith.addf %46, %47 : vector<8x128xf32>
    %49 = arith.negf %48 : vector<8x128xf32>
    %50 = math.exp %49 : vector<8x128xf32>
    %cst_16 = arith.constant 1.000000e+00 : f32
    %51 = vector.broadcast %cst_16 : f32 to vector<8x128xf32>
    %52 = arith.addf %51, %50 : vector<8x128xf32>
    %53 = arith.divf %51, %52 : vector<8x128xf32>
    %54 = vector.extract_strided_slice %44 {offsets = [0, 128], sizes = [8, 128], strides = [1, 1]} : vector<8x384xf32> to vector<8x128xf32>
    %55 = vector.extract_strided_slice %45 {offsets = [0, 128], sizes = [8, 128], strides = [1, 1]} : vector<8x384xf32> to vector<8x128xf32>
    %56 = arith.addf %54, %55 : vector<8x128xf32>
    %57 = arith.negf %56 : vector<8x128xf32>
    %58 = math.exp %57 : vector<8x128xf32>
    %cst_17 = arith.constant 1.000000e+00 : f32
    %59 = vector.broadcast %cst_17 : f32 to vector<8x128xf32>
    %60 = arith.addf %59, %58 : vector<8x128xf32>
    %61 = arith.divf %59, %60 : vector<8x128xf32>
    %62 = vector.extract_strided_slice %44 {offsets = [0, 256], sizes = [8, 128], strides = [1, 1]} : vector<8x384xf32> to vector<8x128xf32>
    %63 = vector.extract_strided_slice %45 {offsets = [0, 256], sizes = [8, 128], strides = [1, 1]} : vector<8x384xf32> to vector<8x128xf32>
    %64 = arith.addf %63, %11 : vector<8x128xf32>
    %65 = arith.mulf %53, %64 : vector<8x128xf32>
    %66 = arith.addf %62, %65 : vector<8x128xf32>
    %67 = math.tanh %66 : vector<8x128xf32>
    %cst_18 = arith.constant 1.000000e+00 : f32
    %68 = vector.broadcast %cst_18 : f32 to vector<8x128xf32>
    %69 = arith.subf %68, %61 : vector<8x128xf32>
    %70 = arith.mulf %69, %67 : vector<8x128xf32>
    %71 = arith.mulf %61, %42 : vector<8x128xf32>
    %72 = arith.addf %70, %71 : vector<8x128xf32>
    %73 = arith.maximumf %42, %72 : vector<8x128xf32>
    %74 = vector.extract_strided_slice %7 {offsets = [2, 0, 0], sizes = [1, 8, 384], strides = [1, 1, 1]} : vector<8x8x384xf32> to vector<1x8x384xf32>
    %75 = vector.shape_cast %74 : vector<1x8x384xf32> to vector<8x384xf32>
    %cst_19 = arith.constant dense<0.000000e+00> : vector<8x384xf32>
    %76 = tpu.matmul %72, %8, %cst_19 {dimension_numbers = #tpu.dot_dimension_numbers<[1], [0], [0], [1], [0, 0, 1, 1], [], []>} : vector<8x128xf32>, vector<128x384xf32>, vector<8x384xf32> -> vector<8x384xf32>
    %77 = vector.extract_strided_slice %75 {offsets = [0, 0], sizes = [8, 128], strides = [1, 1]} : vector<8x384xf32> to vector<8x128xf32>
    %78 = vector.extract_strided_slice %76 {offsets = [0, 0], sizes = [8, 128], strides = [1, 1]} : vector<8x384xf32> to vector<8x128xf32>
    %79 = arith.addf %77, %78 : vector<8x128xf32>
    %80 = arith.negf %79 : vector<8x128xf32>
    %81 = math.exp %80 : vector<8x128xf32>
    %cst_20 = arith.constant 1.000000e+00 : f32
    %82 = vector.broadcast %cst_20 : f32 to vector<8x128xf32>
    %83 = arith.addf %82, %81 : vector<8x128xf32>
    %84 = arith.divf %82, %83 : vector<8x128xf32>
    %85 = vector.extract_strided_slice %75 {offsets = [0, 128], sizes = [8, 128], strides = [1, 1]} : vector<8x384xf32> to vector<8x128xf32>
    %86 = vector.extract_strided_slice %76 {offsets = [0, 128], sizes = [8, 128], strides = [1, 1]} : vector<8x384xf32> to vector<8x128xf32>
    %87 = arith.addf %85, %86 : vector<8x128xf32>
    %88 = arith.negf %87 : vector<8x128xf32>
    %89 = math.exp %88 : vector<8x128xf32>
    %cst_21 = arith.constant 1.000000e+00 : f32
    %90 = vector.broadcast %cst_21 : f32 to vector<8x128xf32>
    %91 = arith.addf %90, %89 : vector<8x128xf32>
    %92 = arith.divf %90, %91 : vector<8x128xf32>
    %93 = vector.extract_strided_slice %75 {offsets = [0, 256], sizes = [8, 128], strides = [1, 1]} : vector<8x384xf32> to vector<8x128xf32>
    %94 = vector.extract_strided_slice %76 {offsets = [0, 256], sizes = [8, 128], strides = [1, 1]} : vector<8x384xf32> to vector<8x128xf32>
    %95 = arith.addf %94, %11 : vector<8x128xf32>
    %96 = arith.mulf %84, %95 : vector<8x128xf32>
    %97 = arith.addf %93, %96 : vector<8x128xf32>
    %98 = math.tanh %97 : vector<8x128xf32>
    %cst_22 = arith.constant 1.000000e+00 : f32
    %99 = vector.broadcast %cst_22 : f32 to vector<8x128xf32>
    %100 = arith.subf %99, %92 : vector<8x128xf32>
    %101 = arith.mulf %100, %98 : vector<8x128xf32>
    %102 = arith.mulf %92, %72 : vector<8x128xf32>
    %103 = arith.addf %101, %102 : vector<8x128xf32>
    %104 = arith.maximumf %73, %103 : vector<8x128xf32>
    %105 = vector.extract_strided_slice %7 {offsets = [3, 0, 0], sizes = [1, 8, 384], strides = [1, 1, 1]} : vector<8x8x384xf32> to vector<1x8x384xf32>
    %106 = vector.shape_cast %105 : vector<1x8x384xf32> to vector<8x384xf32>
    %cst_23 = arith.constant dense<0.000000e+00> : vector<8x384xf32>
    %107 = tpu.matmul %103, %8, %cst_23 {dimension_numbers = #tpu.dot_dimension_numbers<[1], [0], [0], [1], [0, 0, 1, 1], [], []>} : vector<8x128xf32>, vector<128x384xf32>, vector<8x384xf32> -> vector<8x384xf32>
    %108 = vector.extract_strided_slice %106 {offsets = [0, 0], sizes = [8, 128], strides = [1, 1]} : vector<8x384xf32> to vector<8x128xf32>
    %109 = vector.extract_strided_slice %107 {offsets = [0, 0], sizes = [8, 128], strides = [1, 1]} : vector<8x384xf32> to vector<8x128xf32>
    %110 = arith.addf %108, %109 : vector<8x128xf32>
    %111 = arith.negf %110 : vector<8x128xf32>
    %112 = math.exp %111 : vector<8x128xf32>
    %cst_24 = arith.constant 1.000000e+00 : f32
    %113 = vector.broadcast %cst_24 : f32 to vector<8x128xf32>
    %114 = arith.addf %113, %112 : vector<8x128xf32>
    %115 = arith.divf %113, %114 : vector<8x128xf32>
    %116 = vector.extract_strided_slice %106 {offsets = [0, 128], sizes = [8, 128], strides = [1, 1]} : vector<8x384xf32> to vector<8x128xf32>
    %117 = vector.extract_strided_slice %107 {offsets = [0, 128], sizes = [8, 128], strides = [1, 1]} : vector<8x384xf32> to vector<8x128xf32>
    %118 = arith.addf %116, %117 : vector<8x128xf32>
    %119 = arith.negf %118 : vector<8x128xf32>
    %120 = math.exp %119 : vector<8x128xf32>
    %cst_25 = arith.constant 1.000000e+00 : f32
    %121 = vector.broadcast %cst_25 : f32 to vector<8x128xf32>
    %122 = arith.addf %121, %120 : vector<8x128xf32>
    %123 = arith.divf %121, %122 : vector<8x128xf32>
    %124 = vector.extract_strided_slice %106 {offsets = [0, 256], sizes = [8, 128], strides = [1, 1]} : vector<8x384xf32> to vector<8x128xf32>
    %125 = vector.extract_strided_slice %107 {offsets = [0, 256], sizes = [8, 128], strides = [1, 1]} : vector<8x384xf32> to vector<8x128xf32>
    %126 = arith.addf %125, %11 : vector<8x128xf32>
    %127 = arith.mulf %115, %126 : vector<8x128xf32>
    %128 = arith.addf %124, %127 : vector<8x128xf32>
    %129 = math.tanh %128 : vector<8x128xf32>
    %cst_26 = arith.constant 1.000000e+00 : f32
    %130 = vector.broadcast %cst_26 : f32 to vector<8x128xf32>
    %131 = arith.subf %130, %123 : vector<8x128xf32>
    %132 = arith.mulf %131, %129 : vector<8x128xf32>
    %133 = arith.mulf %123, %103 : vector<8x128xf32>
    %134 = arith.addf %132, %133 : vector<8x128xf32>
    %135 = arith.maximumf %104, %134 : vector<8x128xf32>
    %136 = vector.extract_strided_slice %7 {offsets = [4, 0, 0], sizes = [1, 8, 384], strides = [1, 1, 1]} : vector<8x8x384xf32> to vector<1x8x384xf32>
    %137 = vector.shape_cast %136 : vector<1x8x384xf32> to vector<8x384xf32>
    %cst_27 = arith.constant dense<0.000000e+00> : vector<8x384xf32>
    %138 = tpu.matmul %134, %8, %cst_27 {dimension_numbers = #tpu.dot_dimension_numbers<[1], [0], [0], [1], [0, 0, 1, 1], [], []>} : vector<8x128xf32>, vector<128x384xf32>, vector<8x384xf32> -> vector<8x384xf32>
    %139 = vector.extract_strided_slice %137 {offsets = [0, 0], sizes = [8, 128], strides = [1, 1]} : vector<8x384xf32> to vector<8x128xf32>
    %140 = vector.extract_strided_slice %138 {offsets = [0, 0], sizes = [8, 128], strides = [1, 1]} : vector<8x384xf32> to vector<8x128xf32>
    %141 = arith.addf %139, %140 : vector<8x128xf32>
    %142 = arith.negf %141 : vector<8x128xf32>
    %143 = math.exp %142 : vector<8x128xf32>
    %cst_28 = arith.constant 1.000000e+00 : f32
    %144 = vector.broadcast %cst_28 : f32 to vector<8x128xf32>
    %145 = arith.addf %144, %143 : vector<8x128xf32>
    %146 = arith.divf %144, %145 : vector<8x128xf32>
    %147 = vector.extract_strided_slice %137 {offsets = [0, 128], sizes = [8, 128], strides = [1, 1]} : vector<8x384xf32> to vector<8x128xf32>
    %148 = vector.extract_strided_slice %138 {offsets = [0, 128], sizes = [8, 128], strides = [1, 1]} : vector<8x384xf32> to vector<8x128xf32>
    %149 = arith.addf %147, %148 : vector<8x128xf32>
    %150 = arith.negf %149 : vector<8x128xf32>
    %151 = math.exp %150 : vector<8x128xf32>
    %cst_29 = arith.constant 1.000000e+00 : f32
    %152 = vector.broadcast %cst_29 : f32 to vector<8x128xf32>
    %153 = arith.addf %152, %151 : vector<8x128xf32>
    %154 = arith.divf %152, %153 : vector<8x128xf32>
    %155 = vector.extract_strided_slice %137 {offsets = [0, 256], sizes = [8, 128], strides = [1, 1]} : vector<8x384xf32> to vector<8x128xf32>
    %156 = vector.extract_strided_slice %138 {offsets = [0, 256], sizes = [8, 128], strides = [1, 1]} : vector<8x384xf32> to vector<8x128xf32>
    %157 = arith.addf %156, %11 : vector<8x128xf32>
    %158 = arith.mulf %146, %157 : vector<8x128xf32>
    %159 = arith.addf %155, %158 : vector<8x128xf32>
    %160 = math.tanh %159 : vector<8x128xf32>
    %cst_30 = arith.constant 1.000000e+00 : f32
    %161 = vector.broadcast %cst_30 : f32 to vector<8x128xf32>
    %162 = arith.subf %161, %154 : vector<8x128xf32>
    %163 = arith.mulf %162, %160 : vector<8x128xf32>
    %164 = arith.mulf %154, %134 : vector<8x128xf32>
    %165 = arith.addf %163, %164 : vector<8x128xf32>
    %166 = arith.maximumf %135, %165 : vector<8x128xf32>
    %167 = vector.extract_strided_slice %7 {offsets = [5, 0, 0], sizes = [1, 8, 384], strides = [1, 1, 1]} : vector<8x8x384xf32> to vector<1x8x384xf32>
    %168 = vector.shape_cast %167 : vector<1x8x384xf32> to vector<8x384xf32>
    %cst_31 = arith.constant dense<0.000000e+00> : vector<8x384xf32>
    %169 = tpu.matmul %165, %8, %cst_31 {dimension_numbers = #tpu.dot_dimension_numbers<[1], [0], [0], [1], [0, 0, 1, 1], [], []>} : vector<8x128xf32>, vector<128x384xf32>, vector<8x384xf32> -> vector<8x384xf32>
    %170 = vector.extract_strided_slice %168 {offsets = [0, 0], sizes = [8, 128], strides = [1, 1]} : vector<8x384xf32> to vector<8x128xf32>
    %171 = vector.extract_strided_slice %169 {offsets = [0, 0], sizes = [8, 128], strides = [1, 1]} : vector<8x384xf32> to vector<8x128xf32>
    %172 = arith.addf %170, %171 : vector<8x128xf32>
    %173 = arith.negf %172 : vector<8x128xf32>
    %174 = math.exp %173 : vector<8x128xf32>
    %cst_32 = arith.constant 1.000000e+00 : f32
    %175 = vector.broadcast %cst_32 : f32 to vector<8x128xf32>
    %176 = arith.addf %175, %174 : vector<8x128xf32>
    %177 = arith.divf %175, %176 : vector<8x128xf32>
    %178 = vector.extract_strided_slice %168 {offsets = [0, 128], sizes = [8, 128], strides = [1, 1]} : vector<8x384xf32> to vector<8x128xf32>
    %179 = vector.extract_strided_slice %169 {offsets = [0, 128], sizes = [8, 128], strides = [1, 1]} : vector<8x384xf32> to vector<8x128xf32>
    %180 = arith.addf %178, %179 : vector<8x128xf32>
    %181 = arith.negf %180 : vector<8x128xf32>
    %182 = math.exp %181 : vector<8x128xf32>
    %cst_33 = arith.constant 1.000000e+00 : f32
    %183 = vector.broadcast %cst_33 : f32 to vector<8x128xf32>
    %184 = arith.addf %183, %182 : vector<8x128xf32>
    %185 = arith.divf %183, %184 : vector<8x128xf32>
    %186 = vector.extract_strided_slice %168 {offsets = [0, 256], sizes = [8, 128], strides = [1, 1]} : vector<8x384xf32> to vector<8x128xf32>
    %187 = vector.extract_strided_slice %169 {offsets = [0, 256], sizes = [8, 128], strides = [1, 1]} : vector<8x384xf32> to vector<8x128xf32>
    %188 = arith.addf %187, %11 : vector<8x128xf32>
    %189 = arith.mulf %177, %188 : vector<8x128xf32>
    %190 = arith.addf %186, %189 : vector<8x128xf32>
    %191 = math.tanh %190 : vector<8x128xf32>
    %cst_34 = arith.constant 1.000000e+00 : f32
    %192 = vector.broadcast %cst_34 : f32 to vector<8x128xf32>
    %193 = arith.subf %192, %185 : vector<8x128xf32>
    %194 = arith.mulf %193, %191 : vector<8x128xf32>
    %195 = arith.mulf %185, %165 : vector<8x128xf32>
    %196 = arith.addf %194, %195 : vector<8x128xf32>
    %197 = arith.maximumf %166, %196 : vector<8x128xf32>
    %198 = vector.extract_strided_slice %7 {offsets = [6, 0, 0], sizes = [1, 8, 384], strides = [1, 1, 1]} : vector<8x8x384xf32> to vector<1x8x384xf32>
    %199 = vector.shape_cast %198 : vector<1x8x384xf32> to vector<8x384xf32>
    %cst_35 = arith.constant dense<0.000000e+00> : vector<8x384xf32>
    %200 = tpu.matmul %196, %8, %cst_35 {dimension_numbers = #tpu.dot_dimension_numbers<[1], [0], [0], [1], [0, 0, 1, 1], [], []>} : vector<8x128xf32>, vector<128x384xf32>, vector<8x384xf32> -> vector<8x384xf32>
    %201 = vector.extract_strided_slice %199 {offsets = [0, 0], sizes = [8, 128], strides = [1, 1]} : vector<8x384xf32> to vector<8x128xf32>
    %202 = vector.extract_strided_slice %200 {offsets = [0, 0], sizes = [8, 128], strides = [1, 1]} : vector<8x384xf32> to vector<8x128xf32>
    %203 = arith.addf %201, %202 : vector<8x128xf32>
    %204 = arith.negf %203 : vector<8x128xf32>
    %205 = math.exp %204 : vector<8x128xf32>
    %cst_36 = arith.constant 1.000000e+00 : f32
    %206 = vector.broadcast %cst_36 : f32 to vector<8x128xf32>
    %207 = arith.addf %206, %205 : vector<8x128xf32>
    %208 = arith.divf %206, %207 : vector<8x128xf32>
    %209 = vector.extract_strided_slice %199 {offsets = [0, 128], sizes = [8, 128], strides = [1, 1]} : vector<8x384xf32> to vector<8x128xf32>
    %210 = vector.extract_strided_slice %200 {offsets = [0, 128], sizes = [8, 128], strides = [1, 1]} : vector<8x384xf32> to vector<8x128xf32>
    %211 = arith.addf %209, %210 : vector<8x128xf32>
    %212 = arith.negf %211 : vector<8x128xf32>
    %213 = math.exp %212 : vector<8x128xf32>
    %cst_37 = arith.constant 1.000000e+00 : f32
    %214 = vector.broadcast %cst_37 : f32 to vector<8x128xf32>
    %215 = arith.addf %214, %213 : vector<8x128xf32>
    %216 = arith.divf %214, %215 : vector<8x128xf32>
    %217 = vector.extract_strided_slice %199 {offsets = [0, 256], sizes = [8, 128], strides = [1, 1]} : vector<8x384xf32> to vector<8x128xf32>
    %218 = vector.extract_strided_slice %200 {offsets = [0, 256], sizes = [8, 128], strides = [1, 1]} : vector<8x384xf32> to vector<8x128xf32>
    %219 = arith.addf %218, %11 : vector<8x128xf32>
    %220 = arith.mulf %208, %219 : vector<8x128xf32>
    %221 = arith.addf %217, %220 : vector<8x128xf32>
    %222 = math.tanh %221 : vector<8x128xf32>
    %cst_38 = arith.constant 1.000000e+00 : f32
    %223 = vector.broadcast %cst_38 : f32 to vector<8x128xf32>
    %224 = arith.subf %223, %216 : vector<8x128xf32>
    %225 = arith.mulf %224, %222 : vector<8x128xf32>
    %226 = arith.mulf %216, %196 : vector<8x128xf32>
    %227 = arith.addf %225, %226 : vector<8x128xf32>
    %228 = arith.maximumf %197, %227 : vector<8x128xf32>
    %229 = vector.extract_strided_slice %7 {offsets = [7, 0, 0], sizes = [1, 8, 384], strides = [1, 1, 1]} : vector<8x8x384xf32> to vector<1x8x384xf32>
    %230 = vector.shape_cast %229 : vector<1x8x384xf32> to vector<8x384xf32>
    %cst_39 = arith.constant dense<0.000000e+00> : vector<8x384xf32>
    %231 = tpu.matmul %227, %8, %cst_39 {dimension_numbers = #tpu.dot_dimension_numbers<[1], [0], [0], [1], [0, 0, 1, 1], [], []>} : vector<8x128xf32>, vector<128x384xf32>, vector<8x384xf32> -> vector<8x384xf32>
    %232 = vector.extract_strided_slice %230 {offsets = [0, 0], sizes = [8, 128], strides = [1, 1]} : vector<8x384xf32> to vector<8x128xf32>
    %233 = vector.extract_strided_slice %231 {offsets = [0, 0], sizes = [8, 128], strides = [1, 1]} : vector<8x384xf32> to vector<8x128xf32>
    %234 = arith.addf %232, %233 : vector<8x128xf32>
    %235 = arith.negf %234 : vector<8x128xf32>
    %236 = math.exp %235 : vector<8x128xf32>
    %cst_40 = arith.constant 1.000000e+00 : f32
    %237 = vector.broadcast %cst_40 : f32 to vector<8x128xf32>
    %238 = arith.addf %237, %236 : vector<8x128xf32>
    %239 = arith.divf %237, %238 : vector<8x128xf32>
    %240 = vector.extract_strided_slice %230 {offsets = [0, 128], sizes = [8, 128], strides = [1, 1]} : vector<8x384xf32> to vector<8x128xf32>
    %241 = vector.extract_strided_slice %231 {offsets = [0, 128], sizes = [8, 128], strides = [1, 1]} : vector<8x384xf32> to vector<8x128xf32>
    %242 = arith.addf %240, %241 : vector<8x128xf32>
    %243 = arith.negf %242 : vector<8x128xf32>
    %244 = math.exp %243 : vector<8x128xf32>
    %cst_41 = arith.constant 1.000000e+00 : f32
    %245 = vector.broadcast %cst_41 : f32 to vector<8x128xf32>
    %246 = arith.addf %245, %244 : vector<8x128xf32>
    %247 = arith.divf %245, %246 : vector<8x128xf32>
    %248 = vector.extract_strided_slice %230 {offsets = [0, 256], sizes = [8, 128], strides = [1, 1]} : vector<8x384xf32> to vector<8x128xf32>
    %249 = vector.extract_strided_slice %231 {offsets = [0, 256], sizes = [8, 128], strides = [1, 1]} : vector<8x384xf32> to vector<8x128xf32>
    %250 = arith.addf %249, %11 : vector<8x128xf32>
    %251 = arith.mulf %239, %250 : vector<8x128xf32>
    %252 = arith.addf %248, %251 : vector<8x128xf32>
    %253 = math.tanh %252 : vector<8x128xf32>
    %cst_42 = arith.constant 1.000000e+00 : f32
    %254 = vector.broadcast %cst_42 : f32 to vector<8x128xf32>
    %255 = arith.subf %254, %247 : vector<8x128xf32>
    %256 = arith.mulf %255, %253 : vector<8x128xf32>
    %257 = arith.mulf %247, %227 : vector<8x128xf32>
    %258 = arith.addf %256, %257 : vector<8x128xf32>
    %259 = arith.maximumf %228, %258 : vector<8x128xf32>
    %c0_43 = arith.constant 0 : index
    %c0_44 = arith.constant 0 : index
    %260 = vector.load %arg6[%c0_43, %c0_44] : memref<128x4xf32, #tpu.memory_space<vmem>>, vector<128x4xf32>
    %cst_45 = arith.constant dense<0.000000e+00> : vector<8x4xf32>
    %261 = tpu.matmul %259, %260, %cst_45 {dimension_numbers = #tpu.dot_dimension_numbers<[1], [0], [0], [1], [0, 0, 1, 1], [], []>} : vector<8x128xf32>, vector<128x4xf32>, vector<8x4xf32> -> vector<8x4xf32>
    %c0_46 = arith.constant 0 : index
    %c0_47 = arith.constant 0 : index
    %262 = vector.load %arg7[%c0_46, %c0_47] : memref<1x4xf32, #tpu.memory_space<vmem>>, vector<1x4xf32>
    %263 = vector.broadcast %262 : vector<1x4xf32> to vector<8x4xf32>
    %264 = arith.addf %261, %263 : vector<8x4xf32>
    %c0_48 = arith.constant 0 : index
    %c0_49 = arith.constant 0 : index
    %265 = vector.load %arg8[%c0_48, %c0_49] : memref<8x4xf32, #tpu.memory_space<vmem>>, vector<8x4xf32>
    tpu.vector_store %arg8[%c0_48, %c0_49], %264 {strides = array<i32>} : memref<8x4xf32, #tpu.memory_space<vmem>>, vector<8x4xf32>,
    return
  }
  func.func @transform_0(%arg0: i32) -> (i32, i32, i32) {
    %c0_i32 = arith.constant 0 : i32
    %c0_i32_0 = arith.constant 0 : i32
    %c0_i32_1 = arith.constant 0 : i32
    return %c0_i32, %arg0, %c0_i32_0 : i32, i32, i32
  }
  func.func @transform_1(%arg0: i32) -> (i32, i32) {
    %c0_i32 = arith.constant 0 : i32
    %c0_i32_0 = arith.constant 0 : i32
    %c0_i32_1 = arith.constant 0 : i32
    return %c0_i32, %c0_i32_0 : i32, i32
  }
  func.func @transform_2(%arg0: i32) -> (i32, i32) {
    %c0_i32 = arith.constant 0 : i32
    %c0_i32_0 = arith.constant 0 : i32
    %c0_i32_1 = arith.constant 0 : i32
    return %c0_i32, %c0_i32_0 : i32, i32
  }
  func.func @transform_3(%arg0: i32) -> (i32, i32) {
    %c0_i32 = arith.constant 0 : i32
    %c0_i32_0 = arith.constant 0 : i32
    %c0_i32_1 = arith.constant 0 : i32
    return %c0_i32, %c0_i32_0 : i32, i32
  }
  func.func @transform_4(%arg0: i32) -> (i32, i32) {
    %c0_i32 = arith.constant 0 : i32
    %c0_i32_0 = arith.constant 0 : i32
    %c0_i32_1 = arith.constant 0 : i32
    return %c0_i32, %c0_i32_0 : i32, i32
  }
  func.func @transform_5(%arg0: i32) -> (i32, i32) {
    %c0_i32 = arith.constant 0 : i32
    %c0_i32_0 = arith.constant 0 : i32
    %c0_i32_1 = arith.constant 0 : i32
    return %c0_i32, %c0_i32_0 : i32, i32
  }
  func.func @transform_6(%arg0: i32) -> (i32, i32) {
    %c0_i32 = arith.constant 0 : i32
    %c0_i32_0 = arith.constant 0 : i32
    %c0_i32_1 = arith.constant 0 : i32
    return %c0_i32, %c0_i32_0 : i32, i32
  }
  func.func @transform_7(%arg0: i32) -> (i32, i32) {
    %c0_i32 = arith.constant 0 : i32
    %c0_i32_0 = arith.constant 0 : i32
    return %arg0, %c0_i32 : i32, i32
  }
}

</mosaic_0001>

<bundles_post_ra>
// kernel: gru_head_forward.1
= control target key start
LH: loop header
LB: loop body
LE: loop exit
PB: predicated region body
PF: predicated region fallthrough
CT: control target
= control target key end

     0   :  { %v3929_v3 = vmov 0.0   ;;  %vm2468_vm0 = vmmov 0   ;;  %vm1776_vm1 = vcmask 31744   ;;  %s3921_s1 = inlined_call_operand.vmem [shape: f32[128,384], index: 1, kind: input, shape index: {}]   ;;  %s3922_s0 = inlined_call_operand.vmem [shape: f32[8,8,128], index: 0, kind: input, shape index: {}]   ;;  %s3923_s3 = inlined_call_operand.vmem [shape: f32[128,384], index: 3, kind: input, shape index: {}]   ;;  %s3924_s2 = inlined_call_operand.vmem [shape: f32[1,384], index: 2, kind: input, shape index: {}]   ;;  %s3925_s4 = inlined_call_operand.vmem [shape: f32[1,128], index: 4, kind: input, shape index: {}]   ;;  %s3926_s5 = inlined_call_operand.vmem [shape: f32[128,4], index: 5, kind: input, shape index: {}]   ;;  %s3927_s6 = inlined_call_operand.vmem [shape: f32[1,4], index: 6, kind: input, shape index: {}]   ;;  %s3928_s7 = inlined_call_operand.vmem [shape: f32[8,4], index: 7, kind: output, shape index: {}]  }
   0x1   :  { %v80_v0 = vld [vmem:[%s3921_s1 + $0x170] sm:$0xff]  ;;  %v79_v1 = vld [vmem:[%s3921_s1 + $0x168] sm:$0xff]  ;;  %v77_v2 = vld [vmem:[%s3921_s1 + $0x158] sm:$0xff]  ;;  %163 = vmatprep.mubr.f32.mxu0 %v3929_v3 }
   0x2   :  { %99 = vmatprep.subr.mxu0 %v80_v0  ;;  %v76_v4 = vld [vmem:[%s3921_s1 + $0x150] sm:$0xff]  ;;  %v74_v5 = vld [vmem:[%s3921_s1 + $0x140] sm:$0xff]  ;;  %v73_v6 = vld [vmem:[%s3921_s1 + $0x138] sm:$0xff] }
   0x3   :  { %100 = vmatpush1.msra.mxu0 %v79_v1  ;;  %v71_v7 = vld [vmem:[%s3921_s1 + $0x128] sm:$0xff]  ;;  %v70_v8 = vld [vmem:[%s3921_s1 + $0x120] sm:$0xff]  ;;  %v68_v9 = vld [vmem:[%s3921_s1 + $0x110] sm:$0xff] }
   0x4   :  { %101 = vmatprep.subr.mxu0 %v77_v2  ;;  %v67_v10 = vld [vmem:[%s3921_s1 + $0x108] sm:$0xff]  ;;  %v65_v11 = vld [vmem:[%s3921_s1 + $0xf8] sm:$0xff]  ;;  %v64_v12 = vld [vmem:[%s3921_s1 + $0xf0] sm:$0xff] }
   0x5   :  { %102 = vmatpush1.msra.mxu0 %v76_v4  ;;  %v62_v13 = vld [vmem:[%s3921_s1 + $0xe0] sm:$0xff]  ;;  %v81_v14 = vld [vmem:[%s3921_s1 + $0x178] sm:$0xff]  ;;  %v59_v17 = vld [vmem:[%s3921_s1 + $0xc8] sm:$0xff] }
   0x6   :  { %103 = vmatprep.subr.mxu0 %v74_v5  ;;  %v61_v15 = vld [vmem:[%s3921_s1 + $0xd8] sm:$0xff]  ;;  %1977 = vmatprep.subr.mxu1 %v81_v14  ;;  %v78_v16 = vld [vmem:[%s3921_s1 + $0x160] sm:$0xff]  ;;  %v75_v18 = vld [vmem:[%s3921_s1 + $0x148] sm:$0xff] }
   0x7   :  { %104 = vmatpush1.msra.mxu0 %v73_v6  ;;  %1978 = vmatpush3.msra.mxu1 %v81_v14  ;;  %v58_v19 = vld [vmem:[%s3921_s1 + $0xc0] sm:$0xff]  ;;  %v56_v20 = vld [vmem:[%s3921_s1 + $0xb0] sm:$0xff]  ;;  %v55_v22 = vld [vmem:[%s3921_s1 + $0xa8] sm:$0xff] }
   0x8   :  { %105 = vmatprep.subr.mxu0 %v71_v7  ;;  %1979 = vmatprep.subr.mxu1 %v78_v16  ;;  %v72_v21 = vld [vmem:[%s3921_s1 + $0x130] sm:$0xff]  ;;  %v53_v23 = vld [vmem:[%s3921_s1 + $0x98] sm:$0xff]  ;;  %v50_v26 = vld [vmem:[%s3921_s1 + $0x80] sm:$0xff] }
   0x9   :  { %106 = vmatpush1.msra.mxu0 %v70_v8  ;;  %1980 = vmatpush3.msra.mxu1 %v78_v16  ;;  %v69_v24 = vld [vmem:[%s3921_s1 + $0x118] sm:$0xff]  ;;  %v52_v25 = vld [vmem:[%s3921_s1 + $0x90] sm:$0xff]  ;;  %v66_v27 = vld [vmem:[%s3921_s1 + $0x100] sm:$0xff] }
   0xa   :  { %107 = vmatprep.subr.mxu0 %v68_v9  ;;  %1981 = vmatprep.subr.mxu1 %v75_v18  ;;  %v49_v28 = vld [vmem:[%s3921_s1 + $0x78] sm:$0xff]  ;;  %v47_v29 = vld [vmem:[%s3921_s1 + $0x68] sm:$0xff]  ;;  %v46_v31 = vld [vmem:[%s3921_s1 + $0x60] sm:$0xff] }
   0xb   :  { %108 = vmatpush1.msra.mxu0 %v67_v10  ;;  %1982 = vmatpush3.msra.mxu1 %v75_v18  ;;  %v63_v30 = vld [vmem:[%s3921_s1 + $0xe8] sm:$0xff]  ;;  %v44_v32 = vld [vmem:[%s3921_s1 + $0x50] sm:$0xff]  ;;  %v41_v35 = vld [vmem:[%s3921_s1 + $0x38] sm:$0xff] }
   0xc   :  { %109 = vmatprep.subr.mxu0 %v65_v11  ;;  %1983 = vmatprep.subr.mxu1 %v72_v21  ;;  %v60_v33 = vld [vmem:[%s3921_s1 + $0xd0] sm:$0xff]  ;;  %v43_v34 = vld [vmem:[%s3921_s1 + $0x48] sm:$0xff]  ;;  %v57_v36 = vld [vmem:[%s3921_s1 + $0xb8] sm:$0xff] }
   0xd   :  { %110 = vmatpush1.msra.mxu0 %v64_v12  ;;  %1984 = vmatpush3.msra.mxu1 %v72_v21  ;;  %v40_v37 = vld [vmem:[%s3921_s1 + $0x30] sm:$0xff]  ;;  %v38_v38 = vld [vmem:[%s3921_s1 + $0x20] sm:$0xff]  ;;  %v37_v40 = vld [vmem:[%s3921_s1 + $0x18] sm:$0xff] }
   0xe   :  { %111 = vmatprep.subr.mxu0 %v62_v13  ;;  %1985 = vmatprep.subr.mxu1 %v69_v24  ;;  %v54_v39 = vld [vmem:[%s3921_s1 + $0xa0] sm:$0xff]  ;;  %v35_v41 = vld [vmem:[%s3921_s1 + $0x8] sm:$0xff]  ;;  %v2647_v45 = vld [vmem:[%s3923_s3 + $0x170] sm:$0xff] }
   0xf   :  { %112 = vmatpush1.msra.mxu0 %v61_v15  ;;  %1986 = vmatpush3.msra.mxu1 %v69_v24  ;;  %v51_v42 = vld [vmem:[%s3921_s1 + $0x88] sm:$0xff]  ;;  %v34_v43 = vld [vmem:[%s3921_s1] sm:$0xff]  ;;  %3951 = vst [vmem:[#allocation2_spill] sm:$0xff] %v2647_v45  ;;  %v2657_v47 = vld [vmem:[%s3923_s3 + $0x158] sm:$0xff] }
  0x10   :  { %113 = vmatprep.subr.mxu0 %v59_v17  ;;  %1987 = vmatprep.subr.mxu1 %v66_v27  ;;  %v2642_v44 = vld [vmem:[%s3922_s0] sm:$0xff]  ;;  %v2652_v46 = vld [vmem:[%s3923_s3 + $0x168] sm:$0xff]  ;;  %v48_v48 = vld [vmem:[%s3921_s1 + $0x70] sm:$0xff] }
  0x11   :  { %114 = vmatpush1.msra.mxu0 %v58_v19  ;;  %1988 = vmatpush3.msra.mxu1 %v66_v27  ;;  %v2667_v49 = vld [vmem:[%s3923_s3 + $0x150] sm:$0xff]  ;;  %v2674_v50 = vld [vmem:[%s3922_s0 + $0x8] sm:$0xff]  ;;  %v2679_v51 = vld [vmem:[%s3923_s3 + $0x140] sm:$0xff] }
  0x12   :  { %115 = vmatprep.subr.mxu0 %v56_v20  ;;  %1989 = vmatprep.subr.mxu1 %v63_v30  ;;  %v2685_v52 = vld [vmem:[%s3923_s3 + $0x138] sm:$0xff]  ;;  %v2691_v53 = vld [vmem:[%s3923_s3 + $0x128] sm:$0xff]  ;;  %v2701_v55 = vld [vmem:[%s3923_s3 + $0x120] sm:$0xff] }
  0x13   :  { %116 = vmatpush1.msra.mxu0 %v55_v22  ;;  %1990 = vmatpush3.msra.mxu1 %v63_v30  ;;  %v45_v54 = vld [vmem:[%s3921_s1 + $0x58] sm:$0xff]  ;;  %v2708_v56 = vld [vmem:[%s3922_s0 + $0x10] sm:$0xff]  ;;  %v2719_v58 = vld [vmem:[%s3923_s3 + $0x108] sm:$0xff] }
  0x14   :  { %117 = vmatprep.subr.mxu0 %v53_v23  ;;  %1991 = vmatprep.subr.mxu1 %v60_v33  ;;  %v2713_v57 = vld [vmem:[%s3923_s3 + $0x110] sm:$0xff]  ;;  %v2725_v59 = vld [vmem:[%s3923_s3 + $0xf8] sm:$0xff]  ;;  %v42_v60 = vld [vmem:[%s3921_s1 + $0x40] sm:$0xff] }
  0x15   :  { %118 = vmatpush1.msra.mxu0 %v52_v25  ;;  %1992 = vmatpush3.msra.mxu1 %v60_v33  ;;  %v2735_v61 = vld [vmem:[%s3923_s3 + $0xf0] sm:$0xff]  ;;  %v2742_v62 = vld [vmem:[%s3922_s0 + $0x18] sm:$0xff]  ;;  %v2747_v63 = vld [vmem:[%s3923_s3 + $0xe0] sm:$0xff] }
  0x16   :  { %119 = vmatprep.subr.mxu0 %v50_v26  ;;  %1993 = vmatprep.subr.mxu1 %v57_v36  ;;  %v2753_v0 = vld [vmem:[%s3923_s3 + $0xd8] sm:$0xff]  ;;  %v2759_v1 = vld [vmem:[%s3923_s3 + $0xc8] sm:$0xff]  ;;  %v2769_v4 = vld [vmem:[%s3923_s3 + $0xc0] sm:$0xff] }
  0x17   :  { %120 = vmatpush1.msra.mxu0 %v49_v28  ;;  %1994 = vmatpush3.msra.mxu1 %v57_v36  ;;  %v39_v2 = vld [vmem:[%s3921_s1 + $0x28] sm:$0xff]  ;;  %v2776_v5 = vld [vmem:[%s3922_s0 + $0x20] sm:$0xff]  ;;  %v2781_v6 = vld [vmem:[%s3923_s3 + $0xb0] sm:$0xff] }
  0x18   :  { %121 = vmatprep.subr.mxu0 %v47_v29  ;;  %1995 = vmatprep.subr.mxu1 %v54_v39  ;;  %v2787_v7 = vld [vmem:[%s3923_s3 + $0xa8] sm:$0xff]  ;;  %v2793_v8 = vld [vmem:[%s3923_s3 + $0x98] sm:$0xff]  ;;  %v36_v9 = vld [vmem:[%s3921_s1 + $0x10] sm:$0xff] }
  0x19   :  { %122 = vmatpush1.msra.mxu0 %v46_v31  ;;  %1996 = vmatpush3.msra.mxu1 %v54_v39  ;;  %v2803_v10 = vld [vmem:[%s3923_s3 + $0x90] sm:$0xff]  ;;  %v31_v11 = vld [vmem:[%s3922_s0 + $0x28] sm:$0xff]  ;;  %v2813_v12 = vld [vmem:[%s3923_s3 + $0x80] sm:$0xff] }
  0x1a   :  { %123 = vmatprep.subr.mxu0 %v44_v32  ;;  %1997 = vmatprep.subr.mxu1 %v51_v42  ;;  %v2819_v13 = vld [vmem:[%s3923_s3 + $0x78] sm:$0xff]  ;;  %v2825_v14 = vld [vmem:[%s3923_s3 + $0x68] sm:$0xff]  ;;  %v2831_v15 = vld [vmem:[%s3923_s3 + $0x60] sm:$0xff] }
  0x1b   :  { %124 = vmatpush1.msra.mxu0 %v43_v34  ;;  %1998 = vmatpush3.msra.mxu1 %v51_v42  ;;  %v32_v16 = vld [vmem:[%s3922_s0 + $0x30] sm:$0xff]  ;;  %v2847_v18 = vld [vmem:[%s3923_s3 + $0x48] sm:$0xff]  ;;  %v2854_v19 = vld [vmem:[%s3923_s3 + $0x38] sm:$0xff]  ;;  %v84_v42 = vlaneseq }
  0x1c   :  { %125 = vmatprep.subr.mxu0 %v41_v35  ;;  %1999 = vmatprep.subr.mxu1 %v48_v48  ;;  %v2841_v17 = vld [vmem:[%s3923_s3 + $0x50] sm:$0xff]  ;;  %v2866_v21 = vld [vmem:[%s3923_s3 + $0x178] sm:$0xff]  ;;  %v2876_v23 = vld [vmem:[%s3923_s3 + $0x20] sm:$0xff] }
  0x1d   :  { %126 = vmatpush1.msra.mxu0 %v40_v37  ;;  %2000 = vmatpush3.msra.mxu1 %v48_v48  ;;  %v2861_v20 = vld [vmem:[%s3923_s3 + $0x30] sm:$0xff]  ;;  %v33_v22 = vld [vmem:[%s3922_s0 + $0x38] sm:$0xff]  ;;  %v2889_v25 = vld [vmem:[%s3923_s3 + $0x8] sm:$0xff] }
  0x1e   :  { %127 = vmatprep.subr.mxu0 %v38_v38  ;;  %2001 = vmatprep.subr.mxu1 %v45_v54  ;;  %v2882_v24 = vld [vmem:[%s3923_s3 + $0x18] sm:$0xff]  ;;  %3953 = vst [vmem:[#allocation4_spill] sm:$0xff] %v2889_v25  ;;  %v2896_v26 = vld [vmem:[%s3923_s3] sm:$0xff]  ;;  %v2910_v28 = vld [vmem:[%s3923_s3 + $0x148] sm:$0xff] }
  0x1f   :  { %128 = vmatpush1.msra.mxu0 %v37_v40  ;;  %2002 = vmatpush3.msra.mxu1 %v45_v54  ;;  %3952 = vst [vmem:[#allocation3_spill] sm:$0xff] %v2882_v24  ;;  %3954 = vst [vmem:[#allocation5_spill] sm:$0xff] %v2896_v26  ;;  %v2901_v27 = vld [vmem:[%s3923_s3 + $0x160] sm:$0xff]  ;;  %v2919_v29 = vld [vmem:[%s3923_s3 + $0x130] sm:$0xff] }
  0x20   :  { %129 = vmatprep.subr.mxu0 %v35_v41  ;;  %2003 = vmatprep.subr.mxu1 %v42_v60  ;;  %v2927_v30 = vld [vmem:[%s3923_s3 + $0x118] sm:$0xff]  ;;  %v2936_v31 = vld [vmem:[%s3923_s3 + $0x100] sm:$0xff]  ;;  %v2945_v32 = vld [vmem:[%s3923_s3 + $0xe8] sm:$0xff] }
  0x21   :  { %130 = vmatpush1.msra.mxu0 %v34_v43  ;;  %2004 = vmatpush3.msra.mxu1 %v42_v60  ;;  %v2952_v33 = vld [vmem:[%s3923_s3 + $0xd0] sm:$0xff]  ;;  %v2961_v34 = vld [vmem:[%s3923_s3 + $0xb8] sm:$0xff]  ;;  %v2970_v35 = vld [vmem:[%s3923_s3 + $0xa0] sm:$0xff]  ;;  %v85_v43 = vshrl.u32 %v84_v42, 7 }
  0x22   :  { %164 = vmatmul.mubr.f32.vlgmr.msra.gmra.mxu0 %v2642_v44  ;;  %372 = vmatprep.subr.mxu0 %v2647_v45  ;;  %v2979_v36 = vld [vmem:[%s3923_s3 + $0x88] sm:$0xff]  ;;  %v2988_v37 = vld [vmem:[%s3923_s3 + $0x70] sm:$0xff]  ;;  %v2997_v38 = vld [vmem:[%s3923_s3 + $0x58] sm:$0xff] }
  0x23   :  { %373 = vmatpush1.msra.mxu0 %v2652_v46  ;;  %169 = vmatprep.mubr.f32.mxu0 %v3929_v3  ;;  %v3006_v39 = vld [vmem:[%s3923_s3 + $0x40] sm:$0xff]  ;;  %v3015_v40 = vld [vmem:[%s3923_s3 + $0x28] sm:$0xff]  ;;  %v3024_v41 = vld [vmem:[%s3923_s3 + $0x10] sm:$0xff]  ;;  %v90_v54 = vsub.s32 1, %v85_v43 }
  0x24   :  { %374 = vmatprep.subr.mxu0 %v2657_v47  ;;  %2005 = vmatprep.subr.mxu1 %v39_v2  ;;  %3955 = vst [vmem:[#allocation6_spill] sm:$0xff] %v3015_v40  ;;  %3956 = vst [vmem:[#allocation7_spill] sm:$0xff] %v3024_v41  ;;  %v82_v48 = vld [vmem:[%s3924_s2] sm:$0x7] }
  0x25   :  { %375 = vmatpush1.msra.mxu0 %v2667_v49  ;;  %2006 = vmatpush3.msra.mxu1 %v39_v2  ;;  %v91_v2 = vrot.slane %v82_v48, %v90_v54 }
  0x26   :  { %170 = vmatmul.mubr.f32.gmra.mxu0 %v2674_v50  ;;  %376 = vmatprep.subr.mxu0 %v2679_v51 }
  0x27   :  { %377 = vmatpush1.msra.mxu0 %v2685_v52  ;;  %175 = vmatprep.mubr.f32.mxu0 %v3929_v3 }
  0x28   :  { %378 = vmatprep.subr.mxu0 %v2691_v53  ;;  %2007 = vmatprep.subr.mxu1 %v36_v9 }
  0x29   :  { %379 = vmatpush1.msra.mxu0 %v2701_v55  ;;  %2008 = vmatpush3.msra.mxu1 %v36_v9 }
  0x2a   :  { %176 = vmatmul.mubr.f32.gmra.mxu0 %v2708_v56  ;;  %380 = vmatprep.subr.mxu0 %v2713_v57 }
  0x2b   :  { %381 = vmatpush1.msra.mxu0 %v2719_v58  ;;  %181 = vmatprep.mubr.f32.mxu0 %v3929_v3 }
  0x2c   :  { %382 = vmatprep.subr.mxu0 %v2725_v59  ;;  %2009 = vmatprep.mubr.f32.mxu1 %v2642_v44  ;;  %v86_v44 = vsub.s32 0, %v85_v43 }
  0x2d   :  { %383 = vmatpush1.msra.mxu0 %v2735_v61  ;;  %2021 = vmatprep.subr.mxu1 %v3929_v3 }
  0x2e   :  { %182 = vmatmul.mubr.f32.gmra.mxu0 %v2742_v62  ;;  %384 = vmatprep.subr.mxu0 %v2747_v63  ;;  %v87_v60 = vrot.slane %v82_v48, %v86_v44 }
  0x2f   :  { %385 = vmatpush1.msra.mxu0 %v2753_v0  ;;  %187 = vmatprep.mubr.f32.mxu0 %v3929_v3 }
  0x30   :  { %386 = vmatprep.subr.mxu0 %v2759_v1  ;;  %2010 = vmatmul.mubr.f32.vlgmr.msra.gmra.mxu1 %v2674_v50 }
  0x31   :  { %387 = vmatpush1.msra.mxu0 %v2769_v4  ;;  %2022 = vmatpush3.msra.mxu1 %v2866_v21 }
  0x32   :  { %188 = vmatmul.mubr.f32.gmra.mxu0 %v2776_v5  ;;  %388 = vmatprep.subr.mxu0 %v2781_v6 }
  0x33   :  { %389 = vmatpush1.msra.mxu0 %v2787_v7  ;;  %193 = vmatprep.mubr.f32.mxu0 %v3929_v3 }
  0x34   :  { %390 = vmatprep.subr.mxu0 %v2793_v8  ;;  %2023 = vmatprep.subr.mxu1 %v3929_v3 }
  0x35   :  { %391 = vmatpush1.msra.mxu0 %v2803_v10  ;;  %2024 = vmatpush3.msra.mxu1 %v2901_v27 }
  0x36   :  { %194 = vmatmul.mubr.f32.gmra.mxu0 %v31_v11  ;;  %392 = vmatprep.subr.mxu0 %v2813_v12 }
  0x37   :  { %393 = vmatpush1.msra.mxu0 %v2819_v13  ;;  %199 = vmatprep.mubr.f32.mxu0 %v3929_v3 }
  0x38   :  { %394 = vmatprep.subr.mxu0 %v2825_v14  ;;  %2025 = vmatprep.subr.mxu1 %v3929_v3 }
  0x39   :  { %395 = vmatpush1.msra.mxu0 %v2831_v15  ;;  %2026 = vmatpush3.msra.mxu1 %v2910_v28 }
  0x3a   :  { %200 = vmatmul.mubr.f32.gmra.mxu0 %v32_v16  ;;  %396 = vmatprep.subr.mxu0 %v2841_v17 }
  0x3b   :  { %397 = vmatpush1.msra.mxu0 %v2847_v18  ;;  %205 = vmatprep.mubr.f32.mxu0 %v3929_v3 }
  0x3c   :  { %398 = vmatprep.subr.mxu0 %v2854_v19  ;;  %2012 = vmatprep.mubr.f32.mxu1 %v2708_v56 }
  0x3d   :  { %399 = vmatpush1.msra.mxu0 %v2861_v20  ;;  %2027 = vmatprep.subr.mxu1 %v3929_v3 }
  0x3e   :  { %206 = vmatmul.mubr.f32.gmra.mxu0 %v33_v22  ;;  %400 = vmatprep.subr.mxu0 %v2876_v23 }
  0x3f   :  { %401 = vmatpush1.msra.mxu0 %v2882_v24  ;;  %436 = vmatprep.mubr.f32.mxu0 %v3929_v3 }
  0x40   :  { %402 = vmatprep.subr.mxu0 %v2889_v25  ;;  %2013 = vmatmul.mubr.f32.gmra.mxu1 %v2742_v62 }
  0x41   :  { %403 = vmatpush1.msra.mxu0 %v2896_v26  ;;  %2028 = vmatpush3.msra.mxu1 %v2919_v29 }
  0x42   :  { %437 = vmatmul.mubr.f32.vlgmr.msra.gmra.mxu0 %v3929_v3  ;;  %2015 = vmatprep.mubr.f32.mxu1 %v2776_v5 }
  0x43   :  { %2029 = vmatprep.subr.mxu1 %v3929_v3  ;;  %535 = vmatprep.subr.mxu0 %v2647_v45 }
  0x44   :  { %2030 = vmatpush3.msra.mxu1 %v2927_v30  ;;  %536 = vmatpush1.msra.mxu0 %v2652_v46 }
  0x45   :  { %2031 = vmatprep.subr.mxu1 %v3929_v3  ;;  %2016 = vmatmul.mubr.f32.gmra.mxu1 %v31_v11 }
  0x46   :  { %2032 = vmatpush3.msra.mxu1 %v2936_v31  ;;  %2018 = vmatprep.mubr.f32.mxu1 %v32_v16 }
  0x47   :  { %2033 = vmatprep.subr.mxu1 %v3929_v3  ;;  %537 = vmatprep.subr.mxu0 %v2657_v47 }
  0x48   :  { %2034 = vmatpush3.msra.mxu1 %v2945_v32  ;;  %538 = vmatpush1.msra.mxu0 %v2667_v49 }
  0x49   :  { %2035 = vmatprep.subr.mxu1 %v3929_v3  ;;  %2019 = vmatmul.mubr.f32.gmra.mxu1 %v33_v22 }
  0x4a   :  { %2036 = vmatpush3.msra.mxu1 %v2952_v33  ;;  %2053 = vmatprep.mubr.msk.f32.mxu1 %vm2468_vm0, %v3929_v3 }
  0x4b   :  { %2037 = vmatprep.subr.mxu1 %v3929_v3  ;;  %539 = vmatprep.subr.mxu0 %v2679_v51 }
  0x4c   :  { %2038 = vmatpush3.msra.mxu1 %v2961_v34  ;;  %540 = vmatpush1.msra.mxu0 %v2685_v52 }
  0x4d   :  { %2039 = vmatprep.subr.mxu1 %v3929_v3  ;;  %541 = vmatprep.subr.mxu0 %v2691_v53 }
  0x4e   :  { %2040 = vmatpush3.msra.mxu1 %v2970_v35  ;;  %542 = vmatpush1.msra.mxu0 %v2701_v55 }
  0x4f   :  { %2041 = vmatprep.subr.mxu1 %v3929_v3  ;;  %543 = vmatprep.subr.mxu0 %v2713_v57 }
  0x50   :  { %2042 = vmatpush3.msra.mxu1 %v2979_v36  ;;  %544 = vmatpush1.msra.mxu0 %v2719_v58 }
  0x51   :  { %2043 = vmatprep.subr.mxu1 %v3929_v3  ;;  %545 = vmatprep.subr.mxu0 %v2725_v59 }
  0x52   :  { %2044 = vmatpush3.msra.mxu1 %v2988_v37  ;;  %546 = vmatpush1.msra.mxu0 %v2735_v61 }
  0x53   :  { %2045 = vmatprep.subr.mxu1 %v3929_v3  ;;  %547 = vmatprep.subr.mxu0 %v2747_v63 }
  0x54   :  { %2046 = vmatpush3.msra.mxu1 %v2997_v38  ;;  %548 = vmatpush1.msra.mxu0 %v2753_v0 }
  0x55   :  { %2047 = vmatprep.subr.mxu1 %v3929_v3  ;;  %549 = vmatprep.subr.mxu0 %v2759_v1 }
  0x56   :  { %2048 = vmatpush3.msra.mxu1 %v3006_v39  ;;  %550 = vmatpush1.msra.mxu0 %v2769_v4 }
  0x57   :  { %2049 = vmatprep.subr.mxu1 %v3929_v3  ;;  %551 = vmatprep.subr.mxu0 %v2781_v6 }
  0x58   :  { %2050 = vmatpush3.msra.mxu1 %v3015_v40  ;;  %552 = vmatpush1.msra.mxu0 %v2787_v7 }
  0x59   :  { %2051 = vmatprep.subr.mxu1 %v3929_v3  ;;  %553 = vmatprep.subr.mxu0 %v2793_v8 }
  0x5a   :  { %2052 = vmatpush3.msra.mxu1 %v3024_v41  ;;  %554 = vmatpush1.msra.mxu0 %v2803_v10 }
  0x5b   :  { %2054 = vmatmul.mubr.f32.vlgmr.msra.gmra.mxu1 %v3929_v3  ;;  %2056 = vmatprep.subr.mxu1 %v3929_v3 }
  0x5c   :  { %2057 = vmatpush3.msra.mxu1 %v2866_v21  ;;  %555 = vmatprep.subr.mxu0 %v2813_v12 }
  0x5d   :  { %2058 = vmatprep.subr.mxu1 %v3929_v3  ;;  %556 = vmatpush1.msra.mxu0 %v2819_v13 }
  0x5e   :  { %2059 = vmatpush3.msra.mxu1 %v2901_v27  ;;  %557 = vmatprep.subr.mxu0 %v2825_v14 }
  0x5f   :  { %2060 = vmatprep.subr.mxu1 %v3929_v3  ;;  %558 = vmatpush1.msra.mxu0 %v2831_v15 }
  0x60   :  { %2061 = vmatpush3.msra.mxu1 %v2910_v28  ;;  %559 = vmatprep.subr.mxu0 %v2841_v17 }
  0x61   :  { %2062 = vmatprep.subr.mxu1 %v3929_v3  ;;  %560 = vmatpush1.msra.mxu0 %v2847_v18 }
  0x62   :  { %2063 = vmatpush3.msra.mxu1 %v2919_v29  ;;  %561 = vmatprep.subr.mxu0 %v2854_v19 }
  0x63   :  { %2064 = vmatprep.subr.mxu1 %v3929_v3  ;;  %562 = vmatpush1.msra.mxu0 %v2861_v20 }
  0x64   :  { %2065 = vmatpush3.msra.mxu1 %v2927_v30  ;;  %563 = vmatprep.subr.mxu0 %v2876_v23 }
  0x65   :  { %2066 = vmatprep.subr.mxu1 %v3929_v3  ;;  %564 = vmatpush1.msra.mxu0 %v2882_v24 }
  0x66   :  { %2067 = vmatpush3.msra.mxu1 %v2936_v31  ;;  %565 = vmatprep.subr.mxu0 %v2889_v25 }
  0x67   :  { %2068 = vmatprep.subr.mxu1 %v3929_v3  ;;  %566 = vmatpush1.msra.mxu0 %v2896_v26 }
  0x68   :  { %2069 = vmatpush3.msra.mxu1 %v2945_v32  ;;  %599 = vmatprep.mubr.f32.mxu0 %v3929_v3 }
  0x69   :  { %2070 = vmatprep.subr.mxu1 %v3929_v3  ;;  %2088 = vmatprep.mubr.msk.f32.mxu1 %vm2468_vm0, %v3929_v3 }
  0x6a   :  { %2071 = vmatpush3.msra.mxu1 %v2952_v33  ;;  %699 = vmatprep.subr.mxu0 %v2647_v45 }
  0x6b   :  { %2072 = vmatprep.subr.mxu1 %v3929_v3 }
  0x6c   :  { %2073 = vmatpush3.msra.mxu1 %v2961_v34 }
  0x6d   :  { %2074 = vmatprep.subr.mxu1 %v3929_v3 }
  0x6e   :  { %2075 = vmatpush3.msra.mxu1 %v2970_v35 }
  0x6f   :  { %2076 = vmatprep.subr.mxu1 %v3929_v3 }
  0x70   :  { %2077 = vmatpush3.msra.mxu1 %v2979_v36 }
  0x71   :  { %2078 = vmatprep.subr.mxu1 %v3929_v3 }
  0x72   :  { %2079 = vmatpush3.msra.mxu1 %v2988_v37 }
  0x73   :  { %2080 = vmatprep.subr.mxu1 %v3929_v3 }
  0x74   :  { %2081 = vmatpush3.msra.mxu1 %v2997_v38 }
  0x75   :  { %2082 = vmatprep.subr.mxu1 %v3929_v3 }
  0x76   :  { %2083 = vmatpush3.msra.mxu1 %v3006_v39 }
  0x77   :  { %2084 = vmatprep.subr.mxu1 %v3929_v3 }
  0x78   :  { %2085 = vmatpush3.msra.mxu1 %v3015_v40 }
  0x79   :  { %2086 = vmatprep.subr.mxu1 %v3929_v3 }
  0x7a   :  { %2087 = vmatpush3.msra.mxu1 %v3024_v41 }
  0x7b   :  { %2091 = vmatprep.subr.mxu1 %v3929_v3 }
  0xe2   :  { %v165_v50 = vpop.f32.mrf.mxu0 }
  0xe4   :  { %v167_v56 = vpop.f32.mrf.mxu0 }
  0xe6   :  { %v171_v62 = vpop.f32.mrf.mxu0 }
  0xe7   :  { %v3086_v5 = vadd.f32 %v171_v62, %v87_v60 }
  0xe8   :  { %v173_v9 = vpop.f32.mrf.mxu0 }
  0xe9   :  { %3957 = vst [vmem:[#allocation8_spill] sm:$0xff] %v3086_v5  ;;  %v3088_v11 = vadd.f32 %v173_v9, %v91_v2  ;;  %v94_v9 = vsub.s32 2, %v85_v43 }
  0xea   :  { %v177_v16 = vpop.f32.mrf.mxu0 }
  0xeb   :  { %3958 = vst [vmem:[#allocation9_spill] sm:$0xff] %v3088_v11  ;;  %v3090_v22 = vadd.f32 %v177_v16, %v87_v60 }
  0xec   :  { %v179_v42 = vpop.f32.mrf.mxu0 }
  0xed   :  { %3959 = vst [vmem:[#allocation10_spill] sm:$0xff] %v3090_v22  ;;  %v3092_v3 = vadd.f32 %v179_v42, %v91_v2  ;;  %v95_v42 = vrot.slane %v82_v48, %v94_v9 }
  0xee   :  { %v183_v45 = vpop.f32.mrf.mxu0 }
  0xef   :  { %3960 = vst [vmem:[#allocation11_spill] sm:$0xff] %v3092_v3  ;;  %v3094_v41 = vadd.f32 %v183_v45, %v87_v60 }
  0xf0   :  { %v185_v26 = vpop.f32.mrf.mxu0 }
  0xf1   :  { %3961 = vst [vmem:[#allocation12_spill] sm:$0xff] %v3094_v41  ;;  %v3096_v25 = vadd.f32 %v185_v26, %v91_v2  ;;  %v2011_v26 = vpop.f32.mrf.mxu1 }
  0xf2   :  { %v189_v44 = vpop.f32.mrf.mxu0 }
  0xf3   :  { %3962 = vst [vmem:[#allocation13_spill] sm:$0xff] %v3096_v25  ;;  %v3098_v40 = vadd.f32 %v189_v44, %v87_v60  ;;  %v3110_v44 = vadd.f32 %v2011_v26, %v95_v42 }
  0xf4   :  { %v191_v54 = vpop.f32.mrf.mxu0 }
  0xf5   :  { %3963 = vst [vmem:[#allocation14_spill] sm:$0xff] %v3098_v40  ;;  %v3100_v62 = vadd.f32 %v191_v54, %v91_v2 }
  0xf6   :  { %v195_v11 = vpop.f32.mrf.mxu0 }
  0xf7   :  { %3964 = vst [vmem:[#allocation15_spill] sm:$0xff] %v3100_v62  ;;  %v3102_v5 = vadd.f32 %v195_v11, %v87_v60  ;;  %v166_v62 = vadd.f32 %v165_v50, %v87_v60 }
  0xf8   :  { %v197_v16 = vpop.f32.mrf.mxu0 }
  0xf9   :  { %3965 = vst [vmem:[#allocation16_spill] sm:$0xff] %v3102_v5  ;;  %v3104_v22 = vadd.f32 %v197_v16, %v91_v2  ;;  %v278_v16 = vpop.f32.mrf.mxu1 }
  0xfa   :  { %v201_v3 = vpop.f32.mrf.mxu0 }
  0xfb   :  { %3966 = vst [vmem:[#allocation17_spill] sm:$0xff] %v3104_v22  ;;  %v3106_v45 = vadd.f32 %v201_v3, %v87_v60 }
  0xfc   :  { %v203_v41 = vpop.f32.mrf.mxu0 }
  0xfd   :  { %3967 = vst [vmem:[#allocation18_spill] sm:$0xff] %v3106_v45  ;;  %v3108_v25 = vadd.f32 %v203_v41, %v91_v2  ;;  %v168_v41 = vadd.f32 %v167_v56, %v91_v2 }
  0xfe   :  { %v207_v40 = vpop.f32.mrf.mxu0 }
  0xff   :  { %3968 = vst [vmem:[#allocation19_spill] sm:$0xff] %v3108_v25  ;;  %v3112_v54 = vadd.f32 %v207_v40, %v87_v60 }
 0x100   :  { %v209_v43 = vpop.f32.mrf.mxu0  ;;  %v2014_v48 = vpop.f32.mrf.mxu1 }
 0x101   :  { %3969 = vst [vmem:[#allocation20_spill] sm:$0xff] %v3112_v54  ;;  %v3114_v11 = vadd.f32 %v209_v43, %v91_v2  ;;  %v3116_v3 = vadd.f32 %v2014_v48, %v95_v42 }
 0x102   :  { %v438_v5 = vpop.f32.mrf.mxu0  ;;  %v288_v24 = vpop.f32.mrf.mxu1 }
 0x103   :  { %3970 = vst [vmem:[#allocation21_spill] sm:$0xff] %v3114_v11  ;;  %v513_v22 = vadd.f32 %v438_v5, %v166_v62  ;;  %3971 = vst [vmem:[#allocation22_spill] sm:$0xff] %v3116_v3  ;;  %v3118_v26 = vadd.f32 %v288_v24, %v95_v42 }
 0x104   :  { %v440_v45 = vpop.f32.mrf.mxu0 }
 0x105   :  { %v1783_v9 = vmul.f32 -1.442695, %v513_v22  ;;  %3972 = vst [vmem:[#allocation23_spill] sm:$0xff] %v3118_v26  ;;  %v2017_v25 = vpop.f32.mrf.mxu1  ;;  %v520_v40 = vadd.f32 %v440_v45, %v168_v41 }
 0x106   :  { %v3120_v54 = vadd.f32 %v2017_v25, %v95_v42  ;;  %v3131_v25 = vld [vmem:[%s3925_s4] ss:$0 sm:$0xff] }
 0x107   :  { %2338 = vpow2.f32 %v1783_v9  ;;  %v298_v50 = vpop.f32.mrf.mxu1  ;;  %v1784_v11 = vmul.f32 -1.442695, %v520_v40 }
 0x108   :  { %3973 = vst [vmem:[#allocation24_spill] sm:$0xff] %v3120_v54  ;;  %v3122_v60 = vadd.f32 %v298_v50, %v95_v42  ;;  %v279_v50 = vadd.f32 %v278_v16, %v95_v42  ;;  %v3979_v16 = vld [vmem:[#allocation3_spill] sm:$0xff] }
 0x109   :  { %v2020_v43 = vpop.f32.mrf.mxu1  ;;  %2340 = vpow2.f32 %v1784_v11 }
 0x10a   :  { %3974 = vst [vmem:[#allocation25_spill] sm:$0xff] %v3122_v60  ;;  %v3124_v5 = vadd.f32 %v2020_v43, %v95_v42 }
 0x10b   :  { %v308_v22 = vpop.f32.mrf.mxu1 }
 0x10c   :  { %3975 = vst [vmem:[#allocation26_spill] sm:$0xff] %v3124_v5  ;;  %v3126_v62 = vadd.f32 %v308_v22, %v95_v42  ;;  %v3978_v42 = vmov 0.0  }
 0x10e   :  { %3976 = vst [vmem:[#allocation27_spill] sm:$0xff] %v3126_v62 }
 0x114   :  { %v2339_v48 = vpop.eup %2338 }
 0x115   :  { %v517_v56 = vadd.f32 1.0, %v2339_v48 }
 0x116   :  { %v2341_v24 = vpop.eup %2340 }
 0x117   :  { %2342 = vrcp.f32 %v517_v56  ;;  %v524_v9 = vadd.f32 1.0, %v2341_v24  ;;  %v3982_v24 = vld [vmem:[#allocation5_spill] sm:$0xff] }
 0x119   :  { %2344 = vrcp.f32 %v524_v9 }
 0x11b   :  { %v509_v2 = vpop.f32.mrf.mxu1 }
 0x11c   :  { %v527_v41 = vadd.f32 %v3131_v25, %v509_v2  ;;  %v3983_v2 = vld [vmem:[#allocation7_spill] sm:$0xff] }
 0x11d   :  { %v2055_v45 = vpop.f32.mrf.mxu1 }
 0x11e   :  { %v3984_v45 = vld [vmem:[#allocation2_spill] sm:$0xff] }
 0x124   :  { %v2343_v40 = vpop.eup %2342 }
 0x125   :  { %v528_v43 = vmul.f32 %v2343_v40, %v527_v41  ;;  %v3985_v40 = vld [vmem:[#allocation8_spill] sm:$0xff] }
 0x126   :  { %v2345_v11 = vpop.eup %2344 }
 0x127   :  { %v529_v22 = vadd.f32 %v528_v43, %v279_v50  ;;  %v531_v48 = vsub.f32 1.0, %v2345_v11  ;;  %v533_v62 = vmul.f32 0.0, %v2345_v11 }
 0x129   :  { %2346 = vtanh.f32 %v529_v22 }
 0x136   :  { %v2347_v56 = vpop.eup %2346 }
 0x137   :  { %v532_v5 = vmul.f32 %v2347_v56, %v531_v48  ;;  %v3986_v48 = vld [vmem:[#allocation9_spill] sm:$0xff] }
 0x139   :  { %v3134_v54 = vadd.f32 %v533_v62, %v532_v5  ;;  %v3980_v5 = vld [vmem:[#allocation6_spill] sm:$0xff]  ;;  %v3981_v62 = vld [vmem:[#allocation4_spill] sm:$0xff] }
 0x13b   :  { %3977 = vst [vmem:[#allocation28_spill] sm:$0xff] %v3134_v54  ;;  %600 = vmatmul.mubr.f32.vlgmr.msra.gmra.mxu0 %v3134_v54  ;;  %2089 = vmatmul.mubr.f32.vlgmr.msra.gmra.mxu1 %v3134_v54 }
 0x13c   :  { %700 = vmatpush1.msra.mxu0 %v2652_v46  ;;  %2092 = vmatpush3.msra.mxu1 %v2866_v21 }
 0x13d   :  { %701 = vmatprep.subr.mxu0 %v2657_v47  ;;  %2093 = vmatprep.subr.mxu1 %v3978_v42 }
 0x13e   :  { %702 = vmatpush1.msra.mxu0 %v2667_v49  ;;  %2094 = vmatpush3.msra.mxu1 %v2901_v27 }
 0x13f   :  { %703 = vmatprep.subr.mxu0 %v2679_v51  ;;  %2095 = vmatprep.subr.mxu1 %v3978_v42 }
 0x140   :  { %704 = vmatpush1.msra.mxu0 %v2685_v52  ;;  %2096 = vmatpush3.msra.mxu1 %v2910_v28 }
 0x141   :  { %705 = vmatprep.subr.mxu0 %v2691_v53  ;;  %2097 = vmatprep.subr.mxu1 %v3978_v42 }
 0x142   :  { %706 = vmatpush1.msra.mxu0 %v2701_v55  ;;  %2098 = vmatpush3.msra.mxu1 %v2919_v29 }
 0x143   :  { %707 = vmatprep.subr.mxu0 %v2713_v57  ;;  %2099 = vmatprep.subr.mxu1 %v3978_v42 }
 0x144   :  { %708 = vmatpush1.msra.mxu0 %v2719_v58  ;;  %2100 = vmatpush3.msra.mxu1 %v2927_v30 }
 0x145   :  { %709 = vmatprep.subr.mxu0 %v2725_v59  ;;  %2101 = vmatprep.subr.mxu1 %v3978_v42 }
 0x146   :  { %710 = vmatpush1.msra.mxu0 %v2735_v61  ;;  %2102 = vmatpush3.msra.mxu1 %v2936_v31 }
 0x147   :  { %711 = vmatprep.subr.mxu0 %v2747_v63  ;;  %2103 = vmatprep.subr.mxu1 %v3978_v42 }
 0x148   :  { %712 = vmatpush1.msra.mxu0 %v2753_v0  ;;  %2104 = vmatpush3.msra.mxu1 %v2945_v32 }
 0x149   :  { %713 = vmatprep.subr.mxu0 %v2759_v1  ;;  %2105 = vmatprep.subr.mxu1 %v3978_v42 }
 0x14a   :  { %714 = vmatpush1.msra.mxu0 %v2769_v4  ;;  %2106 = vmatpush3.msra.mxu1 %v2952_v33 }
 0x14b   :  { %715 = vmatprep.subr.mxu0 %v2781_v6  ;;  %2107 = vmatprep.subr.mxu1 %v3978_v42 }
 0x14c   :  { %716 = vmatpush1.msra.mxu0 %v2787_v7  ;;  %2108 = vmatpush3.msra.mxu1 %v2961_v34 }
 0x14d   :  { %717 = vmatprep.subr.mxu0 %v2793_v8  ;;  %2109 = vmatprep.subr.mxu1 %v3978_v42 }
 0x14e   :  { %718 = vmatpush1.msra.mxu0 %v2803_v10  ;;  %2110 = vmatpush3.msra.mxu1 %v2970_v35 }
 0x14f   :  { %719 = vmatprep.subr.mxu0 %v2813_v12  ;;  %2111 = vmatprep.subr.mxu1 %v3978_v42 }
 0x150   :  { %720 = vmatpush1.msra.mxu0 %v2819_v13  ;;  %2112 = vmatpush3.msra.mxu1 %v2979_v36 }
 0x151   :  { %721 = vmatprep.subr.mxu0 %v2825_v14  ;;  %2113 = vmatprep.subr.mxu1 %v3978_v42 }
 0x152   :  { %722 = vmatpush1.msra.mxu0 %v2831_v15  ;;  %2114 = vmatpush3.msra.mxu1 %v2988_v37 }
 0x153   :  { %723 = vmatprep.subr.mxu0 %v2841_v17  ;;  %2115 = vmatprep.subr.mxu1 %v3978_v42 }
 0x154   :  { %724 = vmatpush1.msra.mxu0 %v2847_v18  ;;  %2116 = vmatpush3.msra.mxu1 %v2997_v38 }
 0x155   :  { %725 = vmatprep.subr.mxu0 %v2854_v19  ;;  %2117 = vmatprep.subr.mxu1 %v3978_v42 }
 0x156   :  { %726 = vmatpush1.msra.mxu0 %v2861_v20  ;;  %2118 = vmatpush3.msra.mxu1 %v3006_v39 }
 0x157   :  { %727 = vmatprep.subr.mxu0 %v2876_v23  ;;  %2119 = vmatprep.subr.mxu1 %v3978_v42 }
 0x158   :  { %728 = vmatpush1.msra.mxu0 %v3979_v16  ;;  %2120 = vmatpush3.msra.mxu1 %v3980_v5 }
 0x159   :  { %729 = vmatprep.subr.mxu0 %v3981_v62  ;;  %2121 = vmatprep.subr.mxu1 %v3978_v42 }
 0x15a   :  { %730 = vmatpush1.msra.mxu0 %v3982_v24  ;;  %763 = vmatprep.mubr.f32.mxu0 %v3978_v42 }
 0x15b   :  { %2122 = vmatpush3.msra.mxu1 %v3983_v2  ;;  %2123 = vmatprep.mubr.msk.f32.mxu1 %vm2468_vm0, %v3978_v42 }
 0x15c   :  { %863 = vmatprep.subr.mxu0 %v3984_v45  ;;  %2126 = vmatprep.subr.mxu1 %v3978_v42 }
 0x1fb   :  { %v601_v9 = vpop.f32.mrf.mxu0  ;;  %v672_v41 = vpop.f32.mrf.mxu1 }
 0x1fc   :  { %v676_v50 = vadd.f32 %v601_v9, %v3985_v40  ;;  %v690_v45 = vadd.f32 %v3131_v25, %v672_v41 }
 0x1fd   :  { %v2090_v43 = vpop.f32.mrf.mxu1  ;;  %v603_v11 = vpop.f32.mrf.mxu0 }
 0x1fe   :  { %v1785_v22 = vmul.f32 -1.442695, %v676_v50  ;;  %v683_v56 = vadd.f32 %v603_v11, %v3986_v48 }
 0x200   :  { %2348 = vpow2.f32 %v1785_v22  ;;  %v1786_v60 = vmul.f32 -1.442695, %v683_v56 }
 0x202   :  { %2350 = vpow2.f32 %v1786_v60 }
 0x20d   :  { %v2349_v3 = vpop.eup %2348 }
 0x20e   :  { %v680_v26 = vadd.f32 1.0, %v2349_v3  ;;  %v3989_v3 = vld [vmem:[#allocation4_spill] sm:$0xff] }
 0x20f   :  { %v2351_v2 = vpop.eup %2350 }
 0x210   :  { %2352 = vrcp.f32 %v680_v26  ;;  %v687_v24 = vadd.f32 1.0, %v2351_v2  ;;  %v3990_v26 = vld [vmem:[#allocation5_spill] sm:$0xff] }
 0x212   :  { %2354 = vrcp.f32 %v687_v24 }
 0x21d   :  { %v2353_v62 = vpop.eup %2352 }
 0x21e   :  { %v691_v5 = vmul.f32 %v2353_v62, %v690_v45  ;;  %v3992_v62 = vld [vmem:[#allocation2_spill] sm:$0xff] }
 0x21f   :  { %v2355_v40 = vpop.eup %2354  ;;  %v3993_v45 = vld [vmem:[#allocation10_spill] sm:$0xff] }
 0x220   :  { %v692_v9 = vadd.f32 %v691_v5, %v3110_v44  ;;  %v694_v50 = vsub.f32 1.0, %v2355_v40  ;;  %v696_v11 = vmul.f32 %v2355_v40, %v3134_v54  ;;  %v3988_v44 = vld [vmem:[#allocation6_spill] sm:$0xff]  ;;  %v3991_v5 = vld [vmem:[#allocation7_spill] sm:$0xff] }
 0x221   :  { %v3994_v40 = vld [vmem:[#allocation11_spill] sm:$0xff] }
 0x222   :  { %2356 = vtanh.f32 %v692_v9 }
 0x22f   :  { %v2357_v43 = vpop.eup %2356 }
 0x230   :  { %v695_v22 = vmul.f32 %v2357_v43, %v694_v50 }
 0x232   :  { %v3210_v60 = vadd.f32 %v696_v11, %v695_v22 }
 0x234   :  { %3987 = vst [vmem:[#allocation3_spill] sm:$0xff] %v3210_v60  ;;  %764 = vmatmul.mubr.f32.vlgmr.msra.gmra.mxu0 %v3210_v60  ;;  %2124 = vmatmul.mubr.f32.vlgmr.msra.gmra.mxu1 %v3210_v60 }
 0x235   :  { %864 = vmatpush1.msra.mxu0 %v2652_v46  ;;  %2127 = vmatpush3.msra.mxu1 %v2866_v21 }
 0x236   :  { %865 = vmatprep.subr.mxu0 %v2657_v47  ;;  %2128 = vmatprep.subr.mxu1 %v3978_v42 }
 0x237   :  { %866 = vmatpush1.msra.mxu0 %v2667_v49  ;;  %2129 = vmatpush3.msra.mxu1 %v2901_v27 }
 0x238   :  { %867 = vmatprep.subr.mxu0 %v2679_v51  ;;  %2130 = vmatprep.subr.mxu1 %v3978_v42 }
 0x239   :  { %868 = vmatpush1.msra.mxu0 %v2685_v52  ;;  %2131 = vmatpush3.msra.mxu1 %v2910_v28 }
 0x23a   :  { %869 = vmatprep.subr.mxu0 %v2691_v53  ;;  %2132 = vmatprep.subr.mxu1 %v3978_v42 }
 0x23b   :  { %870 = vmatpush1.msra.mxu0 %v2701_v55  ;;  %2133 = vmatpush3.msra.mxu1 %v2919_v29 }
 0x23c   :  { %871 = vmatprep.subr.mxu0 %v2713_v57  ;;  %2134 = vmatprep.subr.mxu1 %v3978_v42 }
 0x23d   :  { %872 = vmatpush1.msra.mxu0 %v2719_v58  ;;  %2135 = vmatpush3.msra.mxu1 %v2927_v30 }
 0x23e   :  { %873 = vmatprep.subr.mxu0 %v2725_v59  ;;  %2136 = vmatprep.subr.mxu1 %v3978_v42 }
 0x23f   :  { %874 = vmatpush1.msra.mxu0 %v2735_v61  ;;  %2137 = vmatpush3.msra.mxu1 %v2936_v31 }
 0x240   :  { %875 = vmatprep.subr.mxu0 %v2747_v63  ;;  %2138 = vmatprep.subr.mxu1 %v3978_v42 }
 0x241   :  { %876 = vmatpush1.msra.mxu0 %v2753_v0  ;;  %2139 = vmatpush3.msra.mxu1 %v2945_v32 }
 0x242   :  { %877 = vmatprep.subr.mxu0 %v2759_v1  ;;  %2140 = vmatprep.subr.mxu1 %v3978_v42 }
 0x243   :  { %878 = vmatpush1.msra.mxu0 %v2769_v4  ;;  %2141 = vmatpush3.msra.mxu1 %v2952_v33 }
 0x244   :  { %879 = vmatprep.subr.mxu0 %v2781_v6  ;;  %2142 = vmatprep.subr.mxu1 %v3978_v42 }
 0x245   :  { %880 = vmatpush1.msra.mxu0 %v2787_v7  ;;  %2143 = vmatpush3.msra.mxu1 %v2961_v34 }
 0x246   :  { %881 = vmatprep.subr.mxu0 %v2793_v8  ;;  %2144 = vmatprep.subr.mxu1 %v3978_v42 }
 0x247   :  { %882 = vmatpush1.msra.mxu0 %v2803_v10  ;;  %2145 = vmatpush3.msra.mxu1 %v2970_v35 }
 0x248   :  { %883 = vmatprep.subr.mxu0 %v2813_v12  ;;  %2146 = vmatprep.subr.mxu1 %v3978_v42 }
 0x249   :  { %884 = vmatpush1.msra.mxu0 %v2819_v13  ;;  %2147 = vmatpush3.msra.mxu1 %v2979_v36 }
 0x24a   :  { %885 = vmatprep.subr.mxu0 %v2825_v14  ;;  %2148 = vmatprep.subr.mxu1 %v3978_v42 }
 0x24b   :  { %886 = vmatpush1.msra.mxu0 %v2831_v15  ;;  %2149 = vmatpush3.msra.mxu1 %v2988_v37 }
 0x24c   :  { %887 = vmatprep.subr.mxu0 %v2841_v17  ;;  %2150 = vmatprep.subr.mxu1 %v3978_v42 }
 0x24d   :  { %888 = vmatpush1.msra.mxu0 %v2847_v18  ;;  %2151 = vmatpush3.msra.mxu1 %v2997_v38 }
 0x24e   :  { %889 = vmatprep.subr.mxu0 %v2854_v19  ;;  %2152 = vmatprep.subr.mxu1 %v3978_v42 }
 0x24f   :  { %890 = vmatpush1.msra.mxu0 %v2861_v20  ;;  %2153 = vmatpush3.msra.mxu1 %v3006_v39 }
 0x250   :  { %891 = vmatprep.subr.mxu0 %v2876_v23  ;;  %2154 = vmatprep.subr.mxu1 %v3978_v42 }
 0x251   :  { %892 = vmatpush1.msra.mxu0 %v3979_v16  ;;  %2155 = vmatpush3.msra.mxu1 %v3988_v44  ;;  %v3995_v44 = vld [vmem:[#allocation23_spill] sm:$0xff] }
 0x252   :  { %893 = vmatprep.subr.mxu0 %v3989_v3  ;;  %2156 = vmatprep.subr.mxu1 %v3978_v42 }
 0x253   :  { %894 = vmatpush1.msra.mxu0 %v3990_v26  ;;  %927 = vmatprep.mubr.f32.mxu0 %v3978_v42 }
 0x254   :  { %2157 = vmatpush3.msra.mxu1 %v3991_v5  ;;  %2158 = vmatprep.mubr.msk.f32.mxu1 %vm2468_vm0, %v3978_v42 }
 0x255   :  { %1027 = vmatprep.subr.mxu0 %v3992_v62  ;;  %2161 = vmatprep.subr.mxu1 %v3978_v42 }
 0x2f4   :  { %v765_v24 = vpop.f32.mrf.mxu0  ;;  %v836_v2 = vpop.f32.mrf.mxu1 }
 0x2f5   :  { %v840_v41 = vadd.f32 %v765_v24, %v3993_v45  ;;  %v854_v62 = vadd.f32 %v3131_v25, %v836_v2  ;;  %v3407_v2 = vld [vmem:[%s3923_s3 + $0x138] sm:$0xff] }
 0x2f6   :  { %v2125_v48 = vpop.f32.mrf.mxu1  ;;  %v767_v9 = vpop.f32.mrf.mxu0 }
 0x2f7   :  { %v1787_v56 = vmul.f32 -1.442695, %v840_v41  ;;  %v847_v50 = vadd.f32 %v767_v9, %v3994_v40 }
 0x2f9   :  { %2358 = vpow2.f32 %v1787_v56  ;;  %v1788_v43 = vmul.f32 -1.442695, %v847_v50  ;;  %v3421_v50 = vld [vmem:[%s3923_s3 + $0x120] sm:$0xff] }
 0x2fb   :  { %2360 = vpow2.f32 %v1788_v43  ;;  %v3435_v43 = vld [vmem:[%s3923_s3 + $0x108] sm:$0xff] }
 0x306   :  { %v2359_v22 = vpop.eup %2358 }
 0x307   :  { %v844_v11 = vadd.f32 1.0, %v2359_v22  ;;  %v3449_v22 = vld [vmem:[%s3923_s3 + $0xf0] sm:$0xff] }
 0x308   :  { %v2361_v54 = vpop.eup %2360 }
 0x309   :  { %2362 = vrcp.f32 %v844_v11  ;;  %v851_v5 = vadd.f32 1.0, %v2361_v54  ;;  %v3463_v11 = vld [vmem:[%s3923_s3 + $0xd8] sm:$0xff] }
 0x30b   :  { %2364 = vrcp.f32 %v851_v5  ;;  %v3400_v5 = vld [vmem:[%s3923_s3 + $0x140] sm:$0xff] }
 0x316   :  { %v2363_v26 = vpop.eup %2362 }
 0x317   :  { %v855_v3 = vmul.f32 %v2363_v26, %v854_v62  ;;  %v3393_v26 = vld [vmem:[%s3923_s3 + $0x150] sm:$0xff]  ;;  %v3477_v62 = vld [vmem:[%s3923_s3 + $0xc0] sm:$0xff] }
 0x318   :  { %v2365_v45 = vpop.eup %2364 }
 0x319   :  { %v856_v24 = vadd.f32 %v855_v3, %v3995_v44  ;;  %v858_v41 = vsub.f32 1.0, %v2365_v45  ;;  %v860_v9 = vmul.f32 %v2365_v45, %v3210_v60  ;;  %v3380_v44 = vld [vmem:[%s3923_s3 + $0x178] sm:$0xff]  ;;  %v3505_v45 = vld [vmem:[%s3923_s3 + $0x90] sm:$0xff] }
 0x31a   :  { %v3386_v3 = vld [vmem:[%s3923_s3 + $0x158] sm:$0xff] }
 0x31b   :  { %2366 = vtanh.f32 %v856_v24  ;;  %v3491_v24 = vld [vmem:[%s3923_s3 + $0xa8] sm:$0xff] }
 0x328   :  { %v2367_v48 = vpop.eup %2366 }
 0x329   :  { %v859_v56 = vmul.f32 %v2367_v48, %v858_v41  ;;  %v3519_v41 = vld [vmem:[%s3923_s3 + $0x78] sm:$0xff]  ;;  %v3533_v48 = vld [vmem:[%s3923_s3 + $0x60] sm:$0xff] }
 0x32b   :  { %v3286_v40 = vadd.f32 %v860_v9, %v859_v56  ;;  %v3547_v56 = vld [vmem:[%s3923_s3 + $0x48] sm:$0xff]  ;;  %v3561_v9 = vld [vmem:[%s3923_s3 + $0x30] sm:$0xff] }
 0x32d   :  { %3996 = vst [vmem:[#allocation8_spill] sm:$0xff] %v3286_v40  ;;  %928 = vmatmul.mubr.f32.vlgmr.msra.gmra.mxu0 %v3286_v40  ;;  %2159 = vmatmul.mubr.f32.vlgmr.msra.gmra.mxu1 %v3286_v40 }
 0x32e   :  { %1028 = vmatpush1.msra.mxu0 %v2652_v46  ;;  %2162 = vmatpush3.msra.mxu1 %v2866_v21  ;;  %v3997_v46 = vld [vmem:[#allocation6_spill] sm:$0xff] }
 0x32f   :  { %1029 = vmatprep.subr.mxu0 %v2657_v47  ;;  %2163 = vmatprep.subr.mxu1 %v3978_v42  ;;  %v3998_v47 = vld [vmem:[#allocation4_spill] sm:$0xff] }
 0x330   :  { %1030 = vmatpush1.msra.mxu0 %v2667_v49  ;;  %2164 = vmatpush3.msra.mxu1 %v2901_v27  ;;  %v3999_v49 = vld [vmem:[#allocation5_spill] sm:$0xff] }
 0x331   :  { %1031 = vmatprep.subr.mxu0 %v2679_v51  ;;  %2165 = vmatprep.subr.mxu1 %v3978_v42  ;;  %v4000_v51 = vld [vmem:[#allocation7_spill] sm:$0xff] }
 0x332   :  { %1032 = vmatpush1.msra.mxu0 %v2685_v52  ;;  %2166 = vmatpush3.msra.mxu1 %v2910_v28  ;;  %v3358_v52 = vld [vmem:[%s3923_s3 + $0x170] sm:$0xff] }
 0x333   :  { %1033 = vmatprep.subr.mxu0 %v2691_v53  ;;  %2167 = vmatprep.subr.mxu1 %v3978_v42 }
 0x334   :  { %1034 = vmatpush1.msra.mxu0 %v2701_v55  ;;  %2168 = vmatpush3.msra.mxu1 %v2919_v29 }
 0x335   :  { %1035 = vmatprep.subr.mxu0 %v2713_v57  ;;  %2169 = vmatprep.subr.mxu1 %v3978_v42  ;;  %v4001_v57 = vld [vmem:[#allocation12_spill] sm:$0xff] }
 0x336   :  { %1036 = vmatpush1.msra.mxu0 %v2719_v58  ;;  %2170 = vmatpush3.msra.mxu1 %v2927_v30 }
 0x337   :  { %1037 = vmatprep.subr.mxu0 %v2725_v59  ;;  %2171 = vmatprep.subr.mxu1 %v3978_v42 }
 0x338   :  { %1038 = vmatpush1.msra.mxu0 %v2735_v61  ;;  %2172 = vmatpush3.msra.mxu1 %v2936_v31 }
 0x339   :  { %1039 = vmatprep.subr.mxu0 %v2747_v63  ;;  %2173 = vmatprep.subr.mxu1 %v3978_v42 }
 0x33a   :  { %1040 = vmatpush1.msra.mxu0 %v2753_v0  ;;  %2174 = vmatpush3.msra.mxu1 %v2945_v32  ;;  %v4002_v0 = vld [vmem:[#allocation13_spill] sm:$0xff] }
 0x33b   :  { %1041 = vmatprep.subr.mxu0 %v2759_v1  ;;  %2175 = vmatprep.subr.mxu1 %v3978_v42 }
 0x33c   :  { %1042 = vmatpush1.msra.mxu0 %v2769_v4  ;;  %2176 = vmatpush3.msra.mxu1 %v2952_v33 }
 0x33d   :  { %1043 = vmatprep.subr.mxu0 %v2781_v6  ;;  %2177 = vmatprep.subr.mxu1 %v3978_v42 }
 0x33e   :  { %1044 = vmatpush1.msra.mxu0 %v2787_v7  ;;  %2178 = vmatpush3.msra.mxu1 %v2961_v34 }
 0x33f   :  { %1045 = vmatprep.subr.mxu0 %v2793_v8  ;;  %2179 = vmatprep.subr.mxu1 %v3978_v42 }
 0x340   :  { %1046 = vmatpush1.msra.mxu0 %v2803_v10  ;;  %2180 = vmatpush3.msra.mxu1 %v2970_v35 }
 0x341   :  { %1047 = vmatprep.subr.mxu0 %v2813_v12  ;;  %2181 = vmatprep.subr.mxu1 %v3978_v42 }
 0x342   :  { %1048 = vmatpush1.msra.mxu0 %v2819_v13  ;;  %2182 = vmatpush3.msra.mxu1 %v2979_v36 }
 0x343   :  { %1049 = vmatprep.subr.mxu0 %v2825_v14  ;;  %2183 = vmatprep.subr.mxu1 %v3978_v42 }
 0x344   :  { %1050 = vmatpush1.msra.mxu0 %v2831_v15  ;;  %2184 = vmatpush3.msra.mxu1 %v2988_v37  ;;  %v4003_v15 = vld [vmem:[#allocation22_spill] sm:$0xff] }
 0x345   :  { %1051 = vmatprep.subr.mxu0 %v2841_v17  ;;  %2185 = vmatprep.subr.mxu1 %v3978_v42 }
 0x346   :  { %1052 = vmatpush1.msra.mxu0 %v2847_v18  ;;  %2186 = vmatpush3.msra.mxu1 %v2997_v38 }
 0x347   :  { %1053 = vmatprep.subr.mxu0 %v2854_v19  ;;  %2187 = vmatprep.subr.mxu1 %v3978_v42 }
 0x348   :  { %1054 = vmatpush1.msra.mxu0 %v2861_v20  ;;  %2188 = vmatpush3.msra.mxu1 %v3006_v39 }
 0x349   :  { %1055 = vmatprep.subr.mxu0 %v2876_v23  ;;  %2189 = vmatprep.subr.mxu1 %v3978_v42 }
 0x34a   :  { %1056 = vmatpush1.msra.mxu0 %v3979_v16  ;;  %2190 = vmatpush3.msra.mxu1 %v3997_v46  ;;  %v3374_v16 = vld [vmem:[%s3923_s3 + $0x168] sm:$0xff] }
 0x34b   :  { %1057 = vmatprep.subr.mxu0 %v3998_v47  ;;  %2191 = vmatprep.subr.mxu1 %v3978_v42  ;;  %v3575_v47 = vld [vmem:[%s3923_s3 + $0x18] sm:$0xff] }
 0x34c   :  { %1058 = vmatpush1.msra.mxu0 %v3999_v49  ;;  %1091 = vmatprep.mubr.f32.mxu0 %v3978_v42  ;;  %v3589_v49 = vld [vmem:[%s3923_s3] sm:$0xff] }
 0x34d   :  { %2192 = vmatpush3.msra.mxu1 %v4000_v51  ;;  %2193 = vmatprep.mubr.msk.f32.mxu1 %vm2468_vm0, %v3978_v42  ;;  %4006 = vst [vmem:[#allocation10_spill] sm:$0xff] %v3589_v49 }
 0x34e   :  { %1191 = vmatprep.subr.mxu0 %v3358_v52  ;;  %2196 = vmatprep.subr.mxu1 %v3978_v42 }
 0x3ed   :  { %v929_v53 = vpop.f32.mrf.mxu0  ;;  %v1000_v55 = vpop.f32.mrf.mxu1 }
 0x3ee   :  { %v1004_v58 = vadd.f32 %v929_v53, %v4001_v57  ;;  %v1018_v12 = vadd.f32 %v3131_v25, %v1000_v55  ;;  %v4007_v55 = vld [vmem:[#allocation14_spill] sm:$0xff] }
 0x3ef   :  { %v2160_v59 = vpop.f32.mrf.mxu1  ;;  %v931_v63 = vpop.f32.mrf.mxu0 }
 0x3f0   :  { %v1789_v61 = vmul.f32 -1.442695, %v1004_v58  ;;  %v1011_v1 = vadd.f32 %v931_v63, %v4002_v0  ;;  %v4008_v63 = vld [vmem:[#allocation15_spill] sm:$0xff] }
 0x3f2   :  { %2368 = vpow2.f32 %v1789_v61  ;;  %v1790_v4 = vmul.f32 -1.442695, %v1011_v1 }
 0x3f4   :  { %2370 = vpow2.f32 %v1790_v4 }
 0x3ff   :  { %v2369_v6 = vpop.eup %2368 }
 0x400   :  { %v1008_v7 = vadd.f32 1.0, %v2369_v6 }
 0x401   :  { %v2371_v8 = vpop.eup %2370 }
 0x402   :  { %2372 = vrcp.f32 %v1008_v7  ;;  %v1015_v10 = vadd.f32 1.0, %v2371_v8 }
 0x404   :  { %2374 = vrcp.f32 %v1015_v10 }
 0x40f   :  { %v2373_v13 = vpop.eup %2372 }
 0x410   :  { %v1019_v14 = vmul.f32 %v2373_v13, %v1018_v12  ;;  %v4009_v13 = vld [vmem:[#allocation25_spill] sm:$0xff] }
 0x411   :  { %v2375_v18 = vpop.eup %2374 }
 0x412   :  { %v1020_v17 = vadd.f32 %v1019_v14, %v4003_v15  ;;  %v1022_v19 = vsub.f32 1.0, %v2375_v18  ;;  %v1024_v23 = vmul.f32 %v2375_v18, %v3286_v40 }
 0x414   :  { %2376 = vtanh.f32 %v1020_v17 }
 0x421   :  { %v2377_v20 = vpop.eup %2376 }
 0x422   :  { %v1023_v21 = vmul.f32 %v2377_v20, %v1022_v19 }
 0x424   :  { %v3367_v54 = vadd.f32 %v1024_v23, %v1023_v21  ;;  %v3615_v23 = vld [vmem:[%s3923_s3 + $0x160] sm:$0xff] }
 0x426   :  { %4004 = vst [vmem:[#allocation9_spill] sm:$0xff] %v3367_v54  ;;  %1092 = vmatmul.mubr.f32.vlgmr.msra.gmra.mxu0 %v3367_v54  ;;  %2194 = vmatmul.mubr.f32.vlgmr.msra.gmra.mxu1 %v3367_v54 }
 0x427   :  { %1192 = vmatpush1.msra.mxu0 %v3374_v16  ;;  %2197 = vmatpush3.msra.mxu1 %v3380_v44 }
 0x428   :  { %1193 = vmatprep.subr.mxu0 %v3386_v3  ;;  %2198 = vmatprep.subr.mxu1 %v3978_v42 }
 0x429   :  { %1194 = vmatpush1.msra.mxu0 %v3393_v26  ;;  %2199 = vmatpush3.msra.mxu1 %v2901_v27  ;;  %v3414_v27 = vld [vmem:[%s3923_s3 + $0x128] sm:$0xff] }
 0x42a   :  { %1195 = vmatprep.subr.mxu0 %v3400_v5  ;;  %2200 = vmatprep.subr.mxu1 %v3978_v42 }
 0x42b   :  { %1196 = vmatpush1.msra.mxu0 %v3407_v2  ;;  %2201 = vmatpush3.msra.mxu1 %v2910_v28  ;;  %v3428_v28 = vld [vmem:[%s3923_s3 + $0x110] sm:$0xff] }
 0x42c   :  { %1197 = vmatprep.subr.mxu0 %v3414_v27  ;;  %2202 = vmatprep.subr.mxu1 %v3978_v42 }
 0x42d   :  { %1198 = vmatpush1.msra.mxu0 %v3421_v50  ;;  %2203 = vmatpush3.msra.mxu1 %v2919_v29  ;;  %v3442_v29 = vld [vmem:[%s3923_s3 + $0xf8] sm:$0xff] }
 0x42e   :  { %1199 = vmatprep.subr.mxu0 %v3428_v28  ;;  %2204 = vmatprep.subr.mxu1 %v3978_v42 }
 0x42f   :  { %1200 = vmatpush1.msra.mxu0 %v3435_v43  ;;  %2205 = vmatpush3.msra.mxu1 %v2927_v30  ;;  %v3456_v30 = vld [vmem:[%s3923_s3 + $0xe0] sm:$0xff] }
 0x430   :  { %1201 = vmatprep.subr.mxu0 %v3442_v29  ;;  %2206 = vmatprep.subr.mxu1 %v3978_v42 }
 0x431   :  { %1202 = vmatpush1.msra.mxu0 %v3449_v22  ;;  %2207 = vmatpush3.msra.mxu1 %v2936_v31  ;;  %v3470_v31 = vld [vmem:[%s3923_s3 + $0xc8] sm:$0xff] }
 0x432   :  { %1203 = vmatprep.subr.mxu0 %v3456_v30  ;;  %2208 = vmatprep.subr.mxu1 %v3978_v42 }
 0x433   :  { %1204 = vmatpush1.msra.mxu0 %v3463_v11  ;;  %2209 = vmatpush3.msra.mxu1 %v2945_v32  ;;  %v3484_v32 = vld [vmem:[%s3923_s3 + $0xb0] sm:$0xff] }
 0x434   :  { %1205 = vmatprep.subr.mxu0 %v3470_v31  ;;  %2210 = vmatprep.subr.mxu1 %v3978_v42 }
 0x435   :  { %1206 = vmatpush1.msra.mxu0 %v3477_v62  ;;  %2211 = vmatpush3.msra.mxu1 %v2952_v33  ;;  %v3498_v33 = vld [vmem:[%s3923_s3 + $0x98] sm:$0xff] }
 0x436   :  { %1207 = vmatprep.subr.mxu0 %v3484_v32  ;;  %2212 = vmatprep.subr.mxu1 %v3978_v42 }
 0x437   :  { %1208 = vmatpush1.msra.mxu0 %v3491_v24  ;;  %2213 = vmatpush3.msra.mxu1 %v2961_v34  ;;  %v3512_v34 = vld [vmem:[%s3923_s3 + $0x80] sm:$0xff] }
 0x438   :  { %1209 = vmatprep.subr.mxu0 %v3498_v33  ;;  %2214 = vmatprep.subr.mxu1 %v3978_v42 }
 0x439   :  { %1210 = vmatpush1.msra.mxu0 %v3505_v45  ;;  %2215 = vmatpush3.msra.mxu1 %v2970_v35  ;;  %v3526_v35 = vld [vmem:[%s3923_s3 + $0x68] sm:$0xff] }
 0x43a   :  { %1211 = vmatprep.subr.mxu0 %v3512_v34  ;;  %2216 = vmatprep.subr.mxu1 %v3978_v42 }
 0x43b   :  { %1212 = vmatpush1.msra.mxu0 %v3519_v41  ;;  %2217 = vmatpush3.msra.mxu1 %v2979_v36  ;;  %v3540_v36 = vld [vmem:[%s3923_s3 + $0x50] sm:$0xff] }
 0x43c   :  { %1213 = vmatprep.subr.mxu0 %v3526_v35  ;;  %2218 = vmatprep.subr.mxu1 %v3978_v42 }
 0x43d   :  { %1214 = vmatpush1.msra.mxu0 %v3533_v48  ;;  %2219 = vmatpush3.msra.mxu1 %v2988_v37  ;;  %v3554_v37 = vld [vmem:[%s3923_s3 + $0x38] sm:$0xff] }
 0x43e   :  { %1215 = vmatprep.subr.mxu0 %v3540_v36  ;;  %2220 = vmatprep.subr.mxu1 %v3978_v42 }
 0x43f   :  { %1216 = vmatpush1.msra.mxu0 %v3547_v56  ;;  %2221 = vmatpush3.msra.mxu1 %v2997_v38  ;;  %v3568_v38 = vld [vmem:[%s3923_s3 + $0x20] sm:$0xff] }
 0x440   :  { %1217 = vmatprep.subr.mxu0 %v3554_v37  ;;  %2222 = vmatprep.subr.mxu1 %v3978_v42 }
 0x441   :  { %1218 = vmatpush1.msra.mxu0 %v3561_v9  ;;  %2223 = vmatpush3.msra.mxu1 %v3006_v39  ;;  %v3582_v39 = vld [vmem:[%s3923_s3 + $0x8] sm:$0xff] }
 0x442   :  { %1219 = vmatprep.subr.mxu0 %v3568_v38  ;;  %2224 = vmatprep.subr.mxu1 %v3978_v42  ;;  %4005 = vst [vmem:[#allocation2_spill] sm:$0xff] %v3582_v39 }
 0x443   :  { %1220 = vmatpush1.msra.mxu0 %v3575_v47  ;;  %2225 = vmatpush3.msra.mxu1 %v3997_v46 }
 0x444   :  { %1221 = vmatprep.subr.mxu0 %v3582_v39  ;;  %2226 = vmatprep.subr.mxu1 %v3978_v42 }
 0x445   :  { %1222 = vmatpush1.msra.mxu0 %v3589_v49  ;;  %1255 = vmatprep.mubr.f32.mxu0 %v3978_v42 }
 0x446   :  { %2227 = vmatpush3.msra.mxu1 %v4000_v51  ;;  %2228 = vmatprep.mubr.msk.f32.mxu1 %vm2468_vm0, %v3978_v42 }
 0x447   :  { %1355 = vmatprep.subr.mxu0 %v3358_v52  ;;  %2231 = vmatprep.subr.mxu1 %v3978_v42 }
 0x4e6   :  { %v1093_v46 = vpop.f32.mrf.mxu0  ;;  %v1164_v53 = vpop.f32.mrf.mxu1 }
 0x4e7   :  { %v1168_v57 = vadd.f32 %v1093_v46, %v4007_v55  ;;  %v1182_v8 = vadd.f32 %v3131_v25, %v1164_v53  ;;  %v3624_v46 = vld [vmem:[%s3923_s3 + $0x148] sm:$0xff]  ;;  %v3633_v53 = vld [vmem:[%s3923_s3 + $0x130] sm:$0xff]  ;;  %v3642_v55 = vld [vmem:[%s3923_s3 + $0x118] sm:$0xff] }
 0x4e8   :  { %v2195_v58 = vpop.f32.mrf.mxu1  ;;  %v1095_v61 = vpop.f32.mrf.mxu0 }
 0x4e9   :  { %v1791_v59 = vmul.f32 -1.442695, %v1168_v57  ;;  %v1175_v0 = vadd.f32 %v1095_v61, %v4008_v63  ;;  %v3651_v57 = vld [vmem:[%s3923_s3 + $0x100] sm:$0xff]  ;;  %v3660_v58 = vld [vmem:[%s3923_s3 + $0xe8] sm:$0xff]  ;;  %v3678_v61 = vld [vmem:[%s3923_s3 + $0xb8] sm:$0xff] }
 0x4ea   :  { %v3687_v63 = vld [vmem:[%s3923_s3 + $0xa0] sm:$0xff] }
 0x4eb   :  { %2378 = vpow2.f32 %v1791_v59  ;;  %v1792_v1 = vmul.f32 -1.442695, %v1175_v0  ;;  %v3669_v59 = vld [vmem:[%s3923_s3 + $0xd0] sm:$0xff]  ;;  %v3696_v0 = vld [vmem:[%s3923_s3 + $0x88] sm:$0xff] }
 0x4ed   :  { %2380 = vpow2.f32 %v1792_v1  ;;  %v3705_v1 = vld [vmem:[%s3923_s3 + $0x70] sm:$0xff] }
 0x4f8   :  { %v2379_v51 = vpop.eup %2378 }
 0x4f9   :  { %v1172_v4 = vadd.f32 1.0, %v2379_v51  ;;  %v3714_v51 = vld [vmem:[%s3923_s3 + $0x58] sm:$0xff] }
 0x4fa   :  { %v2381_v6 = vpop.eup %2380 }
 0x4fb   :  { %2382 = vrcp.f32 %v1172_v4  ;;  %v1179_v7 = vadd.f32 1.0, %v2381_v6  ;;  %v3723_v4 = vld [vmem:[%s3923_s3 + $0x40] sm:$0xff]  ;;  %v3732_v6 = vld [vmem:[%s3923_s3 + $0x28] sm:$0xff] }
 0x4fc   :  { %4010 = vst [vmem:[#allocation11_spill] sm:$0xff] %v3732_v6 }
 0x4fd   :  { %2384 = vrcp.f32 %v1179_v7  ;;  %v3742_v7 = vld [vmem:[%s3923_s3 + $0x10] sm:$0xff] }
 0x4fe   :  { %4011 = vst [vmem:[#allocation23_spill] sm:$0xff] %v3742_v7 }
 0x508   :  { %v2383_v10 = vpop.eup %2382 }
 0x509   :  { %v1183_v12 = vmul.f32 %v2383_v10, %v1182_v8 }
 0x50a   :  { %v2385_v15 = vpop.eup %2384 }
 0x50b   :  { %v1184_v14 = vadd.f32 %v1183_v12, %v4009_v13  ;;  %v1186_v17 = vsub.f32 1.0, %v2385_v15  ;;  %v1188_v20 = vmul.f32 %v2385_v15, %v3367_v54  ;;  %v4012_v12 = vld [vmem:[#allocation16_spill] sm:$0xff] }
 0x50d   :  { %2386 = vtanh.f32 %v1184_v14 }
 0x51a   :  { %v2387_v18 = vpop.eup %2386 }
 0x51b   :  { %v1187_v19 = vmul.f32 %v2387_v18, %v1186_v17  ;;  %v4013_v18 = vld [vmem:[#allocation17_spill] sm:$0xff] }
 0x51d   :  { %v3603_v21 = vadd.f32 %v1188_v20, %v1187_v19 }
 0x51f   :  { %1256 = vmatmul.mubr.f32.vlgmr.msra.gmra.mxu0 %v3603_v21  ;;  %2229 = vmatmul.mubr.f32.vlgmr.msra.gmra.mxu1 %v3603_v21 }
 0x520   :  { %1356 = vmatpush1.msra.mxu0 %v3374_v16  ;;  %2232 = vmatpush3.msra.mxu1 %v3380_v44 }
 0x521   :  { %1357 = vmatprep.subr.mxu0 %v3386_v3  ;;  %2233 = vmatprep.subr.mxu1 %v3978_v42 }
 0x522   :  { %1358 = vmatpush1.msra.mxu0 %v3393_v26  ;;  %2234 = vmatpush3.msra.mxu1 %v3615_v23 }
 0x523   :  { %1359 = vmatprep.subr.mxu0 %v3400_v5  ;;  %2235 = vmatprep.subr.mxu1 %v3978_v42 }
 0x524   :  { %1360 = vmatpush1.msra.mxu0 %v3407_v2  ;;  %2236 = vmatpush3.msra.mxu1 %v3624_v46 }
 0x525   :  { %1361 = vmatprep.subr.mxu0 %v3414_v27  ;;  %2237 = vmatprep.subr.mxu1 %v3978_v42 }
 0x526   :  { %1362 = vmatpush1.msra.mxu0 %v3421_v50  ;;  %2238 = vmatpush3.msra.mxu1 %v3633_v53 }
 0x527   :  { %1363 = vmatprep.subr.mxu0 %v3428_v28  ;;  %2239 = vmatprep.subr.mxu1 %v3978_v42 }
 0x528   :  { %1364 = vmatpush1.msra.mxu0 %v3435_v43  ;;  %2240 = vmatpush3.msra.mxu1 %v3642_v55 }
 0x529   :  { %1365 = vmatprep.subr.mxu0 %v3442_v29  ;;  %2241 = vmatprep.subr.mxu1 %v3978_v42 }
 0x52a   :  { %1366 = vmatpush1.msra.mxu0 %v3449_v22  ;;  %2242 = vmatpush3.msra.mxu1 %v3651_v57 }
 0x52b   :  { %1367 = vmatprep.subr.mxu0 %v3456_v30  ;;  %2243 = vmatprep.subr.mxu1 %v3978_v42 }
 0x52c   :  { %1368 = vmatpush1.msra.mxu0 %v3463_v11  ;;  %2244 = vmatpush3.msra.mxu1 %v3660_v58 }
 0x52d   :  { %1369 = vmatprep.subr.mxu0 %v3470_v31  ;;  %2245 = vmatprep.subr.mxu1 %v3978_v42 }
 0x52e   :  { %1370 = vmatpush1.msra.mxu0 %v3477_v62  ;;  %2246 = vmatpush3.msra.mxu1 %v3669_v59 }
 0x52f   :  { %1371 = vmatprep.subr.mxu0 %v3484_v32  ;;  %2247 = vmatprep.subr.mxu1 %v3978_v42 }
 0x530   :  { %1372 = vmatpush1.msra.mxu0 %v3491_v24  ;;  %2248 = vmatpush3.msra.mxu1 %v3678_v61 }
 0x531   :  { %1373 = vmatprep.subr.mxu0 %v3498_v33  ;;  %2249 = vmatprep.subr.mxu1 %v3978_v42 }
 0x532   :  { %1374 = vmatpush1.msra.mxu0 %v3505_v45  ;;  %2250 = vmatpush3.msra.mxu1 %v3687_v63 }
 0x533   :  { %1375 = vmatprep.subr.mxu0 %v3512_v34  ;;  %2251 = vmatprep.subr.mxu1 %v3978_v42 }
 0x534   :  { %1376 = vmatpush1.msra.mxu0 %v3519_v41  ;;  %2252 = vmatpush3.msra.mxu1 %v3696_v0 }
 0x535   :  { %1377 = vmatprep.subr.mxu0 %v3526_v35  ;;  %2253 = vmatprep.subr.mxu1 %v3978_v42 }
 0x536   :  { %1378 = vmatpush1.msra.mxu0 %v3533_v48  ;;  %2254 = vmatpush3.msra.mxu1 %v3705_v1 }
 0x537   :  { %1379 = vmatprep.subr.mxu0 %v3540_v36  ;;  %2255 = vmatprep.subr.mxu1 %v3978_v42 }
 0x538   :  { %1380 = vmatpush1.msra.mxu0 %v3547_v56  ;;  %2256 = vmatpush3.msra.mxu1 %v3714_v51 }
 0x539   :  { %1381 = vmatprep.subr.mxu0 %v3554_v37  ;;  %2257 = vmatprep.subr.mxu1 %v3978_v42 }
 0x53a   :  { %1382 = vmatpush1.msra.mxu0 %v3561_v9  ;;  %2258 = vmatpush3.msra.mxu1 %v3723_v4 }
 0x53b   :  { %1383 = vmatprep.subr.mxu0 %v3568_v38  ;;  %2259 = vmatprep.subr.mxu1 %v3978_v42 }
 0x53c   :  { %1384 = vmatpush1.msra.mxu0 %v3575_v47  ;;  %2260 = vmatpush3.msra.mxu1 %v3732_v6  ;;  %v4014_v6 = vld [vmem:[#allocation24_spill] sm:$0xff] }
 0x53d   :  { %1385 = vmatprep.subr.mxu0 %v3582_v39  ;;  %2261 = vmatprep.subr.mxu1 %v3978_v42 }
 0x53e   :  { %1386 = vmatpush1.msra.mxu0 %v3589_v49  ;;  %1419 = vmatprep.mubr.f32.mxu0 %v3978_v42 }
 0x53f   :  { %2262 = vmatpush3.msra.mxu1 %v3742_v7  ;;  %2263 = vmatprep.mubr.msk.f32.mxu1 %vm2468_vm0, %v3978_v42 }
 0x540   :  { %1519 = vmatprep.subr.mxu0 %v3358_v52  ;;  %2266 = vmatprep.subr.mxu1 %v3978_v42 }
 0x5df   :  { %v1257_v8 = vpop.f32.mrf.mxu0  ;;  %v1328_v10 = vpop.f32.mrf.mxu1 }
 0x5e0   :  { %v1332_v13 = vadd.f32 %v1257_v8, %v4012_v12  ;;  %v1346_v52 = vadd.f32 %v3131_v25, %v1328_v10  ;;  %v4015_v25 = vld [vmem:[#allocation11_spill] sm:$0xff] }
 0x5e1   :  { %v2230_v14 = vpop.f32.mrf.mxu1  ;;  %v1259_v17 = vpop.f32.mrf.mxu0 }
 0x5e2   :  { %v1793_v15 = vmul.f32 -1.442695, %v1332_v13  ;;  %v1339_v19 = vadd.f32 %v1259_v17, %v4013_v18 }
 0x5e4   :  { %2388 = vpow2.f32 %v1793_v15  ;;  %v1794_v20 = vmul.f32 -1.442695, %v1339_v19 }
 0x5e6   :  { %2390 = vpow2.f32 %v1794_v20  ;;  %v4023_v20 = vld [vmem:[#allocation21_spill] sm:$0xff] }
 0x5f1   :  { %v2389_v54 = vpop.eup %2388 }
 0x5f2   :  { %v1336_v40 = vadd.f32 1.0, %v2389_v54  ;;  %v4018_v54 = vld [vmem:[#allocation23_spill] sm:$0xff] }
 0x5f3   :  { %v2391_v60 = vpop.eup %2390 }
 0x5f4   :  { %2392 = vrcp.f32 %v1336_v40  ;;  %v1343_v7 = vadd.f32 1.0, %v2391_v60  ;;  %v4016_v60 = vld [vmem:[#allocation2_spill] sm:$0xff] }
 0x5f5   :  { %v4017_v40 = vld [vmem:[#allocation10_spill] sm:$0xff] }
 0x5f6   :  { %2394 = vrcp.f32 %v1343_v7 }
 0x601   :  { %v2393_v49 = vpop.eup %2392 }
 0x602   :  { %v1347_v39 = vmul.f32 %v2393_v49, %v1346_v52  ;;  %v1693_v49 = vld [vmem:[%s3926_s5 + $0x50] sm:$0xff] }
 0x603   :  { %v2395_v12 = vpop.eup %2394 }
 0x604   :  { %v1348_v8 = vadd.f32 %v1347_v39, %v4014_v6  ;;  %v1350_v13 = vsub.f32 1.0, %v2395_v12  ;;  %v1352_v17 = vmul.f32 %v2395_v12, %v3603_v21  ;;  %v1694_v39 = vld [vmem:[%s3926_s5 + $0x58] sm:$0xff] }
 0x606   :  { %2396 = vtanh.f32 %v1348_v8 }
 0x613   :  { %v2397_v14 = vpop.eup %2396 }
 0x614   :  { %v1351_v15 = vmul.f32 %v2397_v14, %v1350_v13 }
 0x616   :  { %v3754_v18 = vadd.f32 %v1352_v17, %v1351_v15 }
 0x618   :  { %1420 = vmatmul.mubr.f32.vlgmr.msra.gmra.mxu0 %v3754_v18  ;;  %2264 = vmatmul.mubr.f32.vlgmr.msra.gmra.mxu1 %v3754_v18 }
 0x619   :  { %1520 = vmatpush1.msra.mxu0 %v3374_v16  ;;  %2267 = vmatpush3.msra.mxu1 %v3380_v44 }
 0x61a   :  { %1521 = vmatprep.subr.mxu0 %v3386_v3  ;;  %2268 = vmatprep.subr.mxu1 %v3978_v42  ;;  %v4019_v3 = vld [vmem:[#allocation18_spill] sm:$0xff] }
 0x61b   :  { %1522 = vmatpush1.msra.mxu0 %v3393_v26  ;;  %2269 = vmatpush3.msra.mxu1 %v3615_v23  ;;  %v1692_v23 = vld [vmem:[%s3926_s5 + $0x48] sm:$0xff] }
 0x61c   :  { %1523 = vmatprep.subr.mxu0 %v3400_v5  ;;  %2270 = vmatprep.subr.mxu1 %v3978_v42 }
 0x61d   :  { %1524 = vmatpush1.msra.mxu0 %v3407_v2  ;;  %2271 = vmatpush3.msra.mxu1 %v3624_v46  ;;  %v1691_v46 = vld [vmem:[%s3926_s5 + $0x40] sm:$0xff] }
 0x61e   :  { %1525 = vmatprep.subr.mxu0 %v3414_v27  ;;  %2272 = vmatprep.subr.mxu1 %v3978_v42 }
 0x61f   :  { %1526 = vmatpush1.msra.mxu0 %v3421_v50  ;;  %2273 = vmatpush3.msra.mxu1 %v3633_v53  ;;  %v4020_v50 = vld [vmem:[#allocation19_spill] sm:$0xff]  ;;  %v1690_v53 = vld [vmem:[%s3926_s5 + $0x38] sm:$0xff] }
 0x620   :  { %1527 = vmatprep.subr.mxu0 %v3428_v28  ;;  %2274 = vmatprep.subr.mxu1 %v3978_v42 }
 0x621   :  { %1528 = vmatpush1.msra.mxu0 %v3435_v43  ;;  %2275 = vmatpush3.msra.mxu1 %v3642_v55  ;;  %v1689_v55 = vld [vmem:[%s3926_s5 + $0x30] sm:$0xff] }
 0x622   :  { %1529 = vmatprep.subr.mxu0 %v3442_v29  ;;  %2276 = vmatprep.subr.mxu1 %v3978_v42 }
 0x623   :  { %1530 = vmatpush1.msra.mxu0 %v3449_v22  ;;  %2277 = vmatpush3.msra.mxu1 %v3651_v57  ;;  %v1688_v57 = vld [vmem:[%s3926_s5 + $0x28] sm:$0xff] }
 0x624   :  { %1531 = vmatprep.subr.mxu0 %v3456_v30  ;;  %2278 = vmatprep.subr.mxu1 %v3978_v42 }
 0x625   :  { %1532 = vmatpush1.msra.mxu0 %v3463_v11  ;;  %2279 = vmatpush3.msra.mxu1 %v3660_v58  ;;  %v1687_v58 = vld [vmem:[%s3926_s5 + $0x20] sm:$0xff] }
 0x626   :  { %1533 = vmatprep.subr.mxu0 %v3470_v31  ;;  %2280 = vmatprep.subr.mxu1 %v3978_v42  ;;  %v3829_v31 = vld [vmem:[%s3925_s4] ss:$0 sm:$0xff] }
 0x627   :  { %1534 = vmatpush1.msra.mxu0 %v3477_v62  ;;  %2281 = vmatpush3.msra.mxu1 %v3669_v59  ;;  %v1686_v59 = vld [vmem:[%s3926_s5 + $0x18] sm:$0xff] }
 0x628   :  { %1535 = vmatprep.subr.mxu0 %v3484_v32  ;;  %2282 = vmatprep.subr.mxu1 %v3978_v42 }
 0x629   :  { %1536 = vmatpush1.msra.mxu0 %v3491_v24  ;;  %2283 = vmatpush3.msra.mxu1 %v3678_v61  ;;  %v1685_v61 = vld [vmem:[%s3926_s5 + $0x10] sm:$0xff] }
 0x62a   :  { %1537 = vmatprep.subr.mxu0 %v3498_v33  ;;  %2284 = vmatprep.subr.mxu1 %v3978_v42  ;;  %v4021_v33 = vld [vmem:[#allocation27_spill] sm:$0xff] }
 0x62b   :  { %1538 = vmatpush1.msra.mxu0 %v3505_v45  ;;  %2285 = vmatpush3.msra.mxu1 %v3687_v63  ;;  %v1684_v63 = vld [vmem:[%s3926_s5 + $0x8] sm:$0xff] }
 0x62c   :  { %1539 = vmatprep.subr.mxu0 %v3512_v34  ;;  %2286 = vmatprep.subr.mxu1 %v3978_v42 }
 0x62d   :  { %1540 = vmatpush1.msra.mxu0 %v3519_v41  ;;  %2287 = vmatpush3.msra.mxu1 %v3696_v0  ;;  %v1683_v0 = vld [vmem:[%s3926_s5] sm:$0xff] }
 0x62e   :  { %1541 = vmatprep.subr.mxu0 %v3526_v35  ;;  %2288 = vmatprep.subr.mxu1 %v3978_v42 }
 0x62f   :  { %1542 = vmatpush1.msra.mxu0 %v3533_v48  ;;  %2289 = vmatpush3.msra.mxu1 %v3705_v1 }
 0x630   :  { %1543 = vmatprep.subr.mxu0 %v3540_v36  ;;  %2290 = vmatprep.subr.mxu1 %v3978_v42 }
 0x631   :  { %1544 = vmatpush1.msra.mxu0 %v3547_v56  ;;  %2291 = vmatpush3.msra.mxu1 %v3714_v51 }
 0x632   :  { %1545 = vmatprep.subr.mxu0 %v3554_v37  ;;  %2292 = vmatprep.subr.mxu1 %v3978_v42  ;;  %v1698_v37 = vld [vmem:[%s3926_s5 + $0x78] sm:$0xff] }
 0x633   :  { %1546 = vmatpush1.msra.mxu0 %v3561_v9  ;;  %2293 = vmatpush3.msra.mxu1 %v3723_v4  ;;  %v1697_v9 = vld [vmem:[%s3926_s5 + $0x70] sm:$0xff] }
 0x634   :  { %1547 = vmatprep.subr.mxu0 %v3568_v38  ;;  %2294 = vmatprep.subr.mxu1 %v3978_v42  ;;  %v1696_v38 = vld [vmem:[%s3926_s5 + $0x68] sm:$0xff]  ;;  %v4022_v4 = vld [vmem:[#allocation20_spill] sm:$0xff] }
 0x635   :  { %1548 = vmatpush1.msra.mxu0 %v3575_v47  ;;  %2295 = vmatpush3.msra.mxu1 %v4015_v25  ;;  %v1695_v47 = vld [vmem:[%s3926_s5 + $0x60] sm:$0xff] }
 0x636   :  { %1549 = vmatprep.subr.mxu0 %v4016_v60  ;;  %2296 = vmatprep.subr.mxu1 %v3978_v42  ;;  %v4024_v60 = vld [vmem:[#allocation26_spill] sm:$0xff] }
 0x637   :  { %1550 = vmatpush1.msra.mxu0 %v4017_v40  ;;  %1583 = vmatprep.mubr.f32.mxu0 %v3978_v42 }
 0x638   :  { %2297 = vmatpush3.msra.mxu1 %v4018_v54  ;;  %2298 = vmatprep.mubr.msk.f32.mxu1 %vm2468_vm0, %v3978_v42  ;;  %v4025_v54 = vld [vmem:[#allocation3_spill] sm:$0xff] }
 0x639   :  { %2301 = vmatprep.subr.mxu0 %v3978_v42 }
 0x6d8   :  { %v1421_v16 = vpop.f32.mrf.mxu0  ;;  %v1492_v44 = vpop.f32.mrf.mxu1 }
 0x6d9   :  { %v1496_v26 = vadd.f32 %v1421_v16, %v4019_v3  ;;  %v1510_v62 = vadd.f32 %v3829_v31, %v1492_v44  ;;  %v4026_v16 = vld [vmem:[#allocation28_spill] sm:$0xff] }
 0x6da   :  { %v2265_v5 = vpop.f32.mrf.mxu1  ;;  %v1423_v27 = vpop.f32.mrf.mxu0  ;;  %v698_v44 = vmax.f32 %v4026_v16, %v4025_v54  ;;  %v4027_v3 = vld [vmem:[#allocation8_spill] sm:$0xff] }
 0x6db   :  { %v1795_v2 = vmul.f32 -1.442695, %v1496_v26  ;;  %v1503_v28 = vadd.f32 %v1423_v27, %v4020_v50 }
 0x6dc   :  { %v862_v26 = vmax.f32 %v698_v44, %v4027_v3 }
 0x6dd   :  { %2398 = vpow2.f32 %v1795_v2  ;;  %v1796_v43 = vmul.f32 -1.442695, %v1503_v28  ;;  %v4028_v2 = vld [vmem:[#allocation9_spill] sm:$0xff] }
 0x6de   :  { %v1026_v27 = vmax.f32 %v862_v26, %v4028_v2 }
 0x6df   :  { %2400 = vpow2.f32 %v1796_v43 }
 0x6e0   :  { %v1190_v50 = vmax.f32 %v1026_v27, %v3603_v21 }
 0x6ea   :  { %v2399_v29 = vpop.eup %2398 }
 0x6eb   :  { %v1500_v22 = vadd.f32 1.0, %v2399_v29  ;;  %v1354_v29 = vmax.f32 %v1190_v50, %v3754_v18 }
 0x6ec   :  { %v2401_v30 = vpop.eup %2400 }
 0x6ed   :  { %2402 = vrcp.f32 %v1500_v22  ;;  %v1507_v11 = vadd.f32 1.0, %v2401_v30 }
 0x6ef   :  { %2404 = vrcp.f32 %v1507_v11 }
 0x6fa   :  { %v2403_v32 = vpop.eup %2402 }
 0x6fb   :  { %v1511_v24 = vmul.f32 %v2403_v32, %v1510_v62  ;;  %v1799_v32 = vld [vmem:[%s3927_s6] ss:$0 sm:$0xff] }
 0x6fc   :  { %v2405_v34 = vpop.eup %2404 }
 0x6fd   :  { %v1512_v45 = vadd.f32 %v1511_v24, %v4021_v33  ;;  %v1514_v41 = vsub.f32 1.0, %v2405_v34  ;;  %v1516_v36 = vmul.f32 %v2405_v34, %v3754_v18 }
 0x6ff   :  { %2406 = vtanh.f32 %v1512_v45 }
 0x70c   :  { %v2407_v35 = vpop.eup %2406 }
 0x70d   :  { %v1515_v48 = vmul.f32 %v2407_v35, %v1514_v41 }
 0x70f   :  { %v3834_v56 = vadd.f32 %v1516_v36, %v1515_v48 }
 0x711   :  { %1584 = vmatmul.mubr.f32.vlgmr.msra.gmra.mxu0 %v3834_v56  ;;  %2299 = vmatmul.mubr.f32.vlgmr.msra.gmra.mxu1 %v3834_v56  ;;  %v1518_v11 = vmax.f32 %v1354_v29, %v3834_v56 }
 0x712   :  { %2333 = vmatprep.mubr.msk.f32.mxu0 %vm2468_vm0, %v3978_v42  ;;  %2302 = vmatpush3.msra.mxu0 %v1698_v37 }
 0x713   :  { %2303 = vmatprep.subr.mxu0 %v3978_v42 }
 0x714   :  { %2304 = vmatpush3.msra.mxu0 %v1697_v9 }
 0x715   :  { %2305 = vmatprep.subr.mxu0 %v3978_v42 }
 0x716   :  { %2306 = vmatpush3.msra.mxu0 %v1696_v38 }
 0x717   :  { %2307 = vmatprep.subr.mxu0 %v3978_v42 }
 0x718   :  { %2308 = vmatpush3.msra.mxu0 %v1695_v47 }
 0x719   :  { %2309 = vmatprep.subr.mxu0 %v3978_v42 }
 0x71a   :  { %2310 = vmatpush3.msra.mxu0 %v1694_v39 }
 0x71b   :  { %2311 = vmatprep.subr.mxu0 %v3978_v42 }
 0x71c   :  { %2312 = vmatpush3.msra.mxu0 %v1693_v49 }
 0x71d   :  { %2313 = vmatprep.subr.mxu0 %v3978_v42 }
 0x71e   :  { %2314 = vmatpush3.msra.mxu0 %v1692_v23 }
 0x71f   :  { %2315 = vmatprep.subr.mxu0 %v3978_v42 }
 0x720   :  { %2316 = vmatpush3.msra.mxu0 %v1691_v46 }
 0x721   :  { %2317 = vmatprep.subr.mxu0 %v3978_v42 }
 0x722   :  { %2318 = vmatpush3.msra.mxu0 %v1690_v53 }
 0x723   :  { %2319 = vmatprep.subr.mxu0 %v3978_v42 }
 0x724   :  { %2320 = vmatpush3.msra.mxu0 %v1689_v55 }
 0x725   :  { %2321 = vmatprep.subr.mxu0 %v3978_v42 }
 0x726   :  { %2322 = vmatpush3.msra.mxu0 %v1688_v57 }
 0x727   :  { %2323 = vmatprep.subr.mxu0 %v3978_v42 }
 0x728   :  { %2324 = vmatpush3.msra.mxu0 %v1687_v58 }
 0x729   :  { %2325 = vmatprep.subr.mxu0 %v3978_v42 }
 0x72a   :  { %2326 = vmatpush3.msra.mxu0 %v1686_v59 }
 0x72b   :  { %2327 = vmatprep.subr.mxu0 %v3978_v42 }
 0x72c   :  { %2328 = vmatpush3.msra.mxu0 %v1685_v61 }
 0x72d   :  { %2329 = vmatprep.subr.mxu0 %v3978_v42 }
 0x72e   :  { %2330 = vmatpush3.msra.mxu0 %v1684_v63 }
 0x72f   :  { %2331 = vmatprep.subr.mxu0 %v3978_v42 }
 0x730   :  { %2332 = vmatpush3.msra.mxu0 %v1683_v0 }
 0x7d1   :  { %v1585_v1 = vpop.f32.mrf.mxu0  ;;  %v1656_v51 = vpop.f32.mrf.mxu1 }
 0x7d2   :  { %v1660_v6 = vadd.f32 %v1585_v1, %v4022_v4  ;;  %v1674_v42 = vadd.f32 %v3829_v31, %v1656_v51 }
 0x7d3   :  { %v2300_v7 = vpop.f32.mrf.mxu1  ;;  %v1587_v19 = vpop.f32.mrf.mxu0 }
 0x7d4   :  { %v1797_v10 = vmul.f32 -1.442695, %v1660_v6  ;;  %v1667_v52 = vadd.f32 %v1587_v19, %v4023_v20 }
 0x7d6   :  { %2408 = vpow2.f32 %v1797_v10  ;;  %v1798_v8 = vmul.f32 -1.442695, %v1667_v52 }
 0x7d8   :  { %2410 = vpow2.f32 %v1798_v8 }
 0x7e3   :  { %v2409_v12 = vpop.eup %2408 }
 0x7e4   :  { %v1664_v13 = vadd.f32 1.0, %v2409_v12 }
 0x7e5   :  { %v2411_v14 = vpop.eup %2410 }
 0x7e6   :  { %2412 = vrcp.f32 %v1664_v13  ;;  %v1671_v15 = vadd.f32 1.0, %v2411_v14 }
 0x7e8   :  { %2414 = vrcp.f32 %v1671_v15 }
 0x7f3   :  { %v2413_v17 = vpop.eup %2412 }
 0x7f4   :  { %v1675_v25 = vmul.f32 %v2413_v17, %v1674_v42 }
 0x7f5   :  { %v2415_v5 = vpop.eup %2414 }
 0x7f6   :  { %v1676_v40 = vadd.f32 %v1675_v25, %v4024_v60  ;;  %v1678_v28 = vsub.f32 1.0, %v2415_v5  ;;  %v1680_v30 = vmul.f32 %v2415_v5, %v3834_v56 }
 0x7f8   :  { %2416 = vtanh.f32 %v1676_v40 }
 0x805   :  { %v2417_v43 = vpop.eup %2416 }
 0x806   :  { %v1679_v22 = vmul.f32 %v2417_v43, %v1678_v28 }
 0x808   :  { %v1681_v31 = vadd.f32 %v1680_v30, %v1679_v22 }
 0x80a   :  { %v1682_v62 = vmax.f32 %v1518_v11, %v1681_v31 }
 0x80c   :  { %2334 = vmatmul.mubr.f32.vlgmr.msra.gmra.mxu0 %v1682_v62 }
 0x8cc   :  { %v1772_v24 = vpop.f32.mrf.mxu0 }
 0x8cd   :  { %v1773_v33 = vadd.f32 %v1799_v32, %v1772_v24 }
 0x8ce   :  { %v2335_v21 = vpop.f32.mrf.mxu0 }
 0x8cf   :  { %1777 = vst.msk [vmem:[%s3928_s7] sm:$0xff] %vm1776_vm1, %v1773_v33 }

</bundles_post_ra>
